<compile_context>
chip_gen: v5e
topology: v5e:2x2
jax: 0.10.0
libtpu: 0.0.40
codegen_flags: <defaults>
</compile_context>

<pallas_src>
import jax
import jax.numpy as jnp
from jax.experimental import pallas as pl
from jax.experimental.pallas import tpu as pltpu

HIDDEN = 512      # fixed by the module: nn.Linear(input_dim, 512)
H_CHUNK = 256     # hidden-dim chunk size (HIDDEN % H_CHUNK == 0)
LANE = 128
SUBLANE = 8


def _round_up(n, m):
    return ((n + m - 1) // m) * m


def xvector_kernel(x_ref, w1_ref, b1_ref, w2_ref, b2_ref, o_ref, acc_ref):
    """Fused fc1 -> ReLU -> fc2 for one batch tile.

    x_ref:  (tile_b, D)      bf16
    w1_ref: (D, H)           bf16  (resident across the batch grid)
    b1_ref: (1, H)           f32
    w2_ref: (H, S_pad)       bf16  (resident)
    b2_ref: (1, S_pad)       f32
    o_ref:  (tile_b, S_pad)  f32   (lane-dense, unmasked stores)
    acc_ref:(tile_b, S_pad)  f32   VMEM scratch accumulator
    """
    acc_ref[...] = jnp.zeros_like(acc_ref)
    x = x_ref[...]
    H = w1_ref.shape[1]
    # Chunk the hidden dimension: keeps the (tile_b, H_CHUNK) f32 intermediate
    # small (bounded vreg pressure) and lets the two MXU matmuls per chunk
    # overlap.  Static slices -> zero runtime indexing cost.
    for off in range(0, H, H_CHUNK):
        w1_c = w1_ref[:, off:off + H_CHUNK]          # (D, H_CHUNK) bf16
        b1_c = b1_ref[:, off:off + H_CHUNK]          # (1, H_CHUNK) f32
        w2_c = w2_ref[off:off + H_CHUNK, :]          # (H_CHUNK, S_pad) bf16
        # MXU matmul with bf16 inputs, f32 accumulation.
        h = jnp.dot(x, w1_c, preferred_element_type=jnp.float32)
        # Bias add + ReLU in f32 (v5e VPU has no bf16 elementwise path).
        h = jnp.maximum(h + b1_c, 0.0)
        acc_ref[...] += jnp.dot(h.astype(jnp.bfloat16), w2_c,
                                preferred_element_type=jnp.float32)
    o_ref[...] = acc_ref[...] + b2_ref[...]


def xvector_forward(x, w1, b1, w2, b2, *, tile_b=None,
                    vmem_limit_bytes=32 * 1024 * 1024):
    """x: (B, D) f32; w1: (D, H); b1: (H,); w2: (H, S); b2: (S,) -> (B, S) f32."""
    B, D = x.shape
    H = w1.shape[1]
    S = w2.shape[1]
    assert H % H_CHUNK == 0

    # Batch tile: MXU-aligned (256 fills the 2x256^2 MXU on v6e/v7x, = 2x128 on
    # v5e); small batches get a single sublane-aligned tile.
    if tile_b is None:
        tile_b = 256 if B >= 256 else _round_up(max(B, SUBLANE), SUBLANE)
    B_pad = _round_up(B, tile_b)          # ragged batch -> zero-pad rows
    S_pad = _round_up(S, LANE)            # lane-dense output

    x_p = x if B_pad == B else jnp.pad(x, ((0, B_pad - B), (0, 0)))
    w2_p = w2 if S_pad == S else jnp.pad(w2, ((0, 0), (0, S_pad - S)))
    b2_p = b2 if S_pad == S else jnp.pad(b2, ((0, S_pad - S),))

    # bf16 operands for the MXU; biases / accumulation stay f32.
    x_bf = x_p.astype(jnp.bfloat16)
    w1_bf = w1.astype(jnp.bfloat16)
    w2_bf = w2_p.astype(jnp.bfloat16)
    b1_2d = b1.reshape(1, H).astype(jnp.float32)
    b2_2d = b2_p.reshape(1, S_pad).astype(jnp.float32)

    grid = (B_pad // tile_b,)
    flops = 2 * B_pad * D * H + 2 * B_pad * H * S_pad
    bytes_accessed = (x_bf.size * 2 + w1_bf.size * 2 + w2_bf.size * 2
                      + b1_2d.size * 4 + b2_2d.size * 4 + B_pad * S_pad * 4)

    out = pl.pallas_call(
        xvector_kernel,
        out_shape=jax.ShapeDtypeStruct((B_pad, S_pad), jnp.float32),
        grid_spec=pltpu.PrefetchScalarGridSpec(
            num_scalar_prefetch=0,
            grid=grid,
            in_specs=[
                pl.BlockSpec((tile_b, D), lambda i: (i, 0)),   # x tile (pipelined)
                pl.BlockSpec((D, H), lambda i: (0, 0)),        # w1 (resident)
                pl.BlockSpec((1, H), lambda i: (0, 0)),        # b1
                pl.BlockSpec((H, S_pad), lambda i: (0, 0)),    # w2 (resident)
                pl.BlockSpec((1, S_pad), lambda i: (0, 0)),    # b2
            ],
            out_specs=pl.BlockSpec((tile_b, S_pad), lambda i: (i, 0)),
            scratch_shapes=[pltpu.VMEM((tile_b, S_pad), jnp.float32)],
        ),
        compiler_params=pltpu.CompilerParams(
            dimension_semantics=("parallel",),      # megacore-shard batch tiles (v7x)
            vmem_limit_bytes=vmem_limit_bytes),     # safe within v7x's 64 MiB VMEM
        cost_estimate=pl.CostEstimate(
            flops=flops, transcendentals=0, bytes_accessed=bytes_accessed),
    )(x_bf, w1_bf, b1_2d, w2_bf, b2_2d)

    return out[:B, :S]


def init_params(key, input_dim, num_speakers, hidden=HIDDEN, dtype=jnp.float32):
    """Deterministic init mirroring nn.Linear default (uniform +/- 1/sqrt(fan_in))."""
    k1, k2, k3, k4 = jax.random.split(key, 4)
    lim1 = 1.0 / jnp.sqrt(input_dim)
    lim2 = 1.0 / jnp.sqrt(hidden)
    # Stored already transposed: (in_features, out_features) so kernel does x @ W.
    w1 = jax.random.uniform(k1, (input_dim, hidden), dtype, -lim1, lim1)
    b1 = jax.random.uniform(k2, (hidden,), dtype, -lim1, lim1)
    w2 = jax.random.uniform(k3, (hidden, num_speakers), dtype, -lim2, lim2)
    b2 = jax.random.uniform(k4, (num_speakers,), dtype, -lim2, lim2)
    return w1, b1, w2, b2


if __name__ == "__main__":
    key = jax.random.PRNGKey(0)
    kx, kp = jax.random.split(key)

    # Small problem, but batch >= 2*tile_b so the grid has 2 steps
    # (exercises double-buffering and v7x dual-core sharding).
    batch = 512
    input_dim = 32
    num_speakers = 16

    x = jax.random.normal(kx, (batch, input_dim), dtype=jnp.float32)
    w1, b1, w2, b2 = init_params(kp, input_dim, num_speakers)

    out = xvector_forward(x, w1, b1, w2, b2)
    out = jax.block_until_ready(out)
    assert out.shape == (batch, num_speakers)

    # Reference mirroring the kernel numerics (bf16 MXU inputs, f32 accumulation).
    xb, w1b, w2b = (t.astype(jnp.bfloat16) for t in (x, w1, w2))
    h_ref = jnp.maximum(
        jnp.dot(xb, w1b, preferred_element_type=jnp.float32) + b1, 0.0)
    ref_bf16 = jnp.dot(h_ref.astype(jnp.bfloat16), w2b,
                       preferred_element_type=jnp.float32) + b2
    assert jnp.allclose(out, ref_bf16, atol=1e-3, rtol=1e-3)

    # Loose check against the pure-f32 PyTorch-style reference
    # (tolerance reflects intentional bf16 MXU inputs).
    ref_f32 = jnp.maximum(x @ w1 + b1, 0.0) @ w2 + b2
    assert jnp.allclose(out, ref_f32, atol=1e-1, rtol=1e-1)

    print("KERNEL_OK")
</pallas_src>

<mosaic_0001>
module attributes {stable_mosaic.version = 11 : i64} {
  func.func @xvector_kernel(%arg0: i32, %arg1: memref<256x32xbf16, #tpu.memory_space<vmem>>, %arg2: memref<32x512xbf16, #tpu.memory_space<vmem>>, %arg3: memref<1x512xf32, #tpu.memory_space<vmem>>, %arg4: memref<512x128xbf16, #tpu.memory_space<vmem>>, %arg5: memref<1x128xf32, #tpu.memory_space<vmem>>, %arg6: memref<256x128xf32, #tpu.memory_space<vmem>>, %arg7: memref<256x128xf32, #tpu.memory_space<vmem>>) attributes {dimension_semantics = [#tpu.dimension_semantics<parallel>], iteration_bounds = array<i64: 2>, scalar_prefetch = 0 : i64, scratch_operands = 1 : i64, tpu.core_type = #tpu.core_type<tc>, window_params = [{transform_indices = @transform_0, window_bounds = array<i64: 256, 32>}, {pipeline_mode = #tpu.pipeline_mode<synchronous>, transform_indices = @transform_1, window_bounds = array<i64: 32, 512>}, {pipeline_mode = #tpu.pipeline_mode<synchronous>, transform_indices = @transform_2, window_bounds = array<i64: 1, 512>}, {pipeline_mode = #tpu.pipeline_mode<synchronous>, transform_indices = @transform_3, window_bounds = array<i64: 512, 128>}, {pipeline_mode = #tpu.pipeline_mode<synchronous>, transform_indices = @transform_4, window_bounds = array<i64: 1, 128>}, {transform_indices = @transform_5, window_bounds = array<i64: 256, 128>}]} {
    %cst = arith.constant 0.000000e+00 : f32
    %0 = vector.broadcast %cst : f32 to vector<256x128xf32>
    %c0 = arith.constant 0 : index
    %c0_0 = arith.constant 0 : index
    %1 = vector.load %arg7[%c0, %c0_0] : memref<256x128xf32, #tpu.memory_space<vmem>>, vector<256x128xf32>
    tpu.vector_store %arg7[%c0, %c0_0], %0 {strides = array<i32>} : memref<256x128xf32, #tpu.memory_space<vmem>>, vector<256x128xf32>,
    %c0_1 = arith.constant 0 : index
    %c0_2 = arith.constant 0 : index
    %2 = vector.load %arg1[%c0_1, %c0_2] : memref<256x32xbf16, #tpu.memory_space<vmem>>, vector<256x32xbf16>
    %c0_3 = arith.constant 0 : index
    %c0_4 = arith.constant 0 : index
    %3 = vector.load %arg2[%c0_3, %c0_4] : memref<32x512xbf16, #tpu.memory_space<vmem>>, vector<32x256xbf16>
    %c0_5 = arith.constant 0 : index
    %c0_6 = arith.constant 0 : index
    %4 = vector.load %arg3[%c0_5, %c0_6] : memref<1x512xf32, #tpu.memory_space<vmem>>, vector<1x256xf32>
    %c0_7 = arith.constant 0 : index
    %c0_8 = arith.constant 0 : index
    %5 = vector.load %arg4[%c0_7, %c0_8] : memref<512x128xbf16, #tpu.memory_space<vmem>>, vector<256x128xbf16>
    %cst_9 = arith.constant dense<0.000000e+00> : vector<256x256xf32>
    %6 = tpu.matmul %2, %3, %cst_9 {dimension_numbers = #tpu.dot_dimension_numbers<[1], [0], [0], [1], [0, 0, 1, 1], [], []>} : vector<256x32xbf16>, vector<32x256xbf16>, vector<256x256xf32> -> vector<256x256xf32>
    %7 = vector.broadcast %4 : vector<1x256xf32> to vector<256x256xf32>
    %8 = arith.addf %6, %7 : vector<256x256xf32>
    %cst_10 = arith.constant 0.000000e+00 : f32
    %9 = vector.broadcast %cst_10 : f32 to vector<256x256xf32>
    %10 = arith.maximumf %8, %9 : vector<256x256xf32>
    %c0_11 = arith.constant 0 : index
    %c0_12 = arith.constant 0 : index
    %11 = vector.load %arg7[%c0_11, %c0_12] : memref<256x128xf32, #tpu.memory_space<vmem>>, vector<256x128xf32>
    %12 = arith.truncf %10 : vector<256x256xf32> to vector<256x256xbf16>
    %cst_13 = arith.constant dense<0.000000e+00> : vector<256x128xf32>
    %13 = tpu.matmul %12, %5, %cst_13 {dimension_numbers = #tpu.dot_dimension_numbers<[1], [0], [0], [1], [0, 0, 1, 1], [], []>} : vector<256x256xbf16>, vector<256x128xbf16>, vector<256x128xf32> -> vector<256x128xf32>
    %14 = arith.addf %11, %13 : vector<256x128xf32>
    %c0_14 = arith.constant 0 : index
    %c0_15 = arith.constant 0 : index
    %15 = vector.load %arg7[%c0_14, %c0_15] : memref<256x128xf32, #tpu.memory_space<vmem>>, vector<256x128xf32>
    tpu.vector_store %arg7[%c0_14, %c0_15], %14 {strides = array<i32>} : memref<256x128xf32, #tpu.memory_space<vmem>>, vector<256x128xf32>,
    %c0_16 = arith.constant 0 : index
    %c256 = arith.constant 256 : index
    %16 = vector.load %arg2[%c0_16, %c256] : memref<32x512xbf16, #tpu.memory_space<vmem>>, vector<32x256xbf16>
    %c0_17 = arith.constant 0 : index
    %c256_18 = arith.constant 256 : index
    %17 = vector.load %arg3[%c0_17, %c256_18] : memref<1x512xf32, #tpu.memory_space<vmem>>, vector<1x256xf32>
    %c256_19 = arith.constant 256 : index
    %c0_20 = arith.constant 0 : index
    %18 = vector.load %arg4[%c256_19, %c0_20] : memref<512x128xbf16, #tpu.memory_space<vmem>>, vector<256x128xbf16>
    %cst_21 = arith.constant dense<0.000000e+00> : vector<256x256xf32>
    %19 = tpu.matmul %2, %16, %cst_21 {dimension_numbers = #tpu.dot_dimension_numbers<[1], [0], [0], [1], [0, 0, 1, 1], [], []>} : vector<256x32xbf16>, vector<32x256xbf16>, vector<256x256xf32> -> vector<256x256xf32>
    %20 = vector.broadcast %17 : vector<1x256xf32> to vector<256x256xf32>
    %21 = arith.addf %19, %20 : vector<256x256xf32>
    %cst_22 = arith.constant 0.000000e+00 : f32
    %22 = vector.broadcast %cst_22 : f32 to vector<256x256xf32>
    %23 = arith.maximumf %21, %22 : vector<256x256xf32>
    %c0_23 = arith.constant 0 : index
    %c0_24 = arith.constant 0 : index
    %24 = vector.load %arg7[%c0_23, %c0_24] : memref<256x128xf32, #tpu.memory_space<vmem>>, vector<256x128xf32>
    %25 = arith.truncf %23 : vector<256x256xf32> to vector<256x256xbf16>
    %cst_25 = arith.constant dense<0.000000e+00> : vector<256x128xf32>
    %26 = tpu.matmul %25, %18, %cst_25 {dimension_numbers = #tpu.dot_dimension_numbers<[1], [0], [0], [1], [0, 0, 1, 1], [], []>} : vector<256x256xbf16>, vector<256x128xbf16>, vector<256x128xf32> -> vector<256x128xf32>
    %27 = arith.addf %24, %26 : vector<256x128xf32>
    %c0_26 = arith.constant 0 : index
    %c0_27 = arith.constant 0 : index
    %28 = vector.load %arg7[%c0_26, %c0_27] : memref<256x128xf32, #tpu.memory_space<vmem>>, vector<256x128xf32>
    tpu.vector_store %arg7[%c0_26, %c0_27], %27 {strides = array<i32>} : memref<256x128xf32, #tpu.memory_space<vmem>>, vector<256x128xf32>,
    %c0_28 = arith.constant 0 : index
    %c0_29 = arith.constant 0 : index
    %29 = vector.load %arg7[%c0_28, %c0_29] : memref<256x128xf32, #tpu.memory_space<vmem>>, vector<256x128xf32>
    %c0_30 = arith.constant 0 : index
    %c0_31 = arith.constant 0 : index
    %30 = vector.load %arg5[%c0_30, %c0_31] : memref<1x128xf32, #tpu.memory_space<vmem>>, vector<1x128xf32>
    %31 = vector.broadcast %30 : vector<1x128xf32> to vector<256x128xf32>
    %32 = arith.addf %29, %31 : vector<256x128xf32>
    %c0_32 = arith.constant 0 : index
    %c0_33 = arith.constant 0 : index
    %33 = vector.load %arg6[%c0_32, %c0_33] : memref<256x128xf32, #tpu.memory_space<vmem>>, vector<256x128xf32>
    tpu.vector_store %arg6[%c0_32, %c0_33], %32 {strides = array<i32>} : memref<256x128xf32, #tpu.memory_space<vmem>>, vector<256x128xf32>,
    return
  }
  func.func @transform_0(%arg0: i32) -> (i32, i32) {
    %c0_i32 = arith.constant 0 : i32
    %c0_i32_0 = arith.constant 0 : i32
    return %arg0, %c0_i32 : i32, i32
  }
  func.func @transform_1(%arg0: i32) -> (i32, i32) {
    %c0_i32 = arith.constant 0 : i32
    %c0_i32_0 = arith.constant 0 : i32
    %c0_i32_1 = arith.constant 0 : i32
    return %c0_i32, %c0_i32_0 : i32, i32
  }
  func.func @transform_2(%arg0: i32) -> (i32, i32) {
    %c0_i32 = arith.constant 0 : i32
    %c0_i32_0 = arith.constant 0 : i32
    %c0_i32_1 = arith.constant 0 : i32
    return %c0_i32, %c0_i32_0 : i32, i32
  }
  func.func @transform_3(%arg0: i32) -> (i32, i32) {
    %c0_i32 = arith.constant 0 : i32
    %c0_i32_0 = arith.constant 0 : i32
    %c0_i32_1 = arith.constant 0 : i32
    return %c0_i32, %c0_i32_0 : i32, i32
  }
  func.func @transform_4(%arg0: i32) -> (i32, i32) {
    %c0_i32 = arith.constant 0 : i32
    %c0_i32_0 = arith.constant 0 : i32
    %c0_i32_1 = arith.constant 0 : i32
    return %c0_i32, %c0_i32_0 : i32, i32
  }
  func.func @transform_5(%arg0: i32) -> (i32, i32) {
    %c0_i32 = arith.constant 0 : i32
    %c0_i32_0 = arith.constant 0 : i32
    return %arg0, %c0_i32 : i32, i32
  }
}

</mosaic_0001>

<bundles_post_ra>
// kernel: tpu_custom_call.1
= control target key start
LH: loop header
LB: loop body
LE: loop exit
PB: predicated region body
PF: predicated region fallthrough
CT: control target
= control target key end

     0   :  { %10 = vsyncpa [#allocation4], 0  ;;  %s3298_s0 = inlined_call_operand.vmem [shape: bf16[512,32], index: 0, kind: input, shape index: {}]   ;;  %s3299_s1 = inlined_call_operand.vmem [shape: bf16[32,512], index: 1, kind: input, shape index: {}]   ;;  %s3300_s2 = inlined_call_operand.hbm [shape: f32[1,512], index: 2, kind: input, shape index: {}]   ;;  %s3301_s3 = inlined_call_operand.vmem [shape: bf16[512,128], index: 3, kind: input, shape index: {}]   ;;  %s3302_s4 = inlined_call_operand.vmem [shape: f32[1,128], index: 4, kind: input, shape index: {}]   ;;  %s3303_s5 = inlined_call_operand.hbm [shape: f32[512,128], index: 5, kind: output, shape index: {}]  }
   0x1   :  { %11 = vsyncpa [#allocation5], 0 }
   0x2   :  { %13 = vsyncpa [#allocation5 + $0x1], 0  ;;  %s2580_s18 = smov 0   ;;  %s2582_s19 = smov 0  }
   0x3   :  { %s2584_s20 = smov 0   ;;  %s2586_s21 = smov 0  }
   0x4 LB: > { %s2601_s22 = sadd.s32 4294967295, %s2545_s21   ;;  %s2037_s23 = sadd.s32 4294967294, %s2545_s21   ;;  %s2545_s21 = sphi %s2586_s21, %s3309_s21   ;;  %s2541_s20 = sphi %s2584_s20, %s3308_s20   ;;  %s2537_s19 = sphi %s2582_s19, %s3307_s19   ;;  %s2533_s18 = sphi %s2580_s18, %s3306_s18  }
   0x5   : > { %s2605_s24 = sadd.s32 1, %s2545_s21   ;;  %s136_s25 = sadd.s32 1, %s2541_s20 }
   0x6   : > { %s133_s26 = ssub.s32 %s2545_s21, %s2605_s24  ;;  %p146_p0 = scmp.ne.s32.totalorder %s2541_s20, %s2537_s19 }
   0x7   : > { %p134_p1 = scmp.eq.s32.totalorder %s133_s26, 0  ;;  %p147_p2 = scmp.eq.s32.totalorder %s2601_s22, 1 }
   0x8   : > { %p152_p3 = scmp.ne.s32.totalorder %s2537_s19, %s2533_s18  ;;  %p153_p4 = scmp.eq.s32.totalorder %s2037_s23, 1 }
   0x9   : > { %s2616_s27 = scalar_select %p134_p1, %s2541_s20, %s136_s25  }
   0xa   : > { %p2618_p5 = por %p147_p2, %p146_p0  ;;  %p2622_p6 = por %p153_p4, %p152_p3 }
   0xb   : > { %p2038_p7 = scmp.ge.s32.totalorder %s2545_s21, 1  ;;  %p160_p8 = scmp.lt.s32.totalorder %s2545_s21, 3 }
   0xc   : > { %p2410_p9 = scmp.eq.s32.totalorder %s2601_s22, 0  ;;  %s175_s7 = sshll.u32 %s3300_s2, 4  ;;  %s176_s7 = int_to_ptr.hbm [resolvable:$true] %s175_s7 }
   0xd   : > { %p161_p10 = pnand %p2038_p7, %p160_p8  ;;  %s2547_s8 = smov [#allocation3]  }
   0xe   : > { %s177_s9 = sshll.u32 %s2547_s8, 4  ;;  %s178_s9 = int_to_ptr.vmem [resolvable:$true] %s177_s9 }
   0xf   : > { %p2402_p11 = pneg %p161_p10  ;;  %205 = sbr.rel (%p161_p10) target bundleno = 819 (0x333), region = 40 }
  0x11   : > { %p2403_p12 = pnand %p2410_p9, %p2402_p11 }
  0x13   : > { %2405 = dma.hbm_to_vmem [thread:$0]  (!%p2403_p12), %s176_s7, 64, %s178_s9, [#allocation4]  }
  0x14   : > { %2524 = dma.done.wait (%p2410_p9), [#allocation4], 64  }
  0x15   : > { %2526 = vsyncadd (%p2410_p9), [#allocation4], 4294967232  ;;  %s2044_s10 = sshll.u32 %s2601_s22, 5  ;;  %v2120_v0 = vld [vmem:[%s3299_s1 + $0x20] sm:$0xf]  ;;  %vm448_vm0 = vcmask 261120  }
  0x16   : > { %p235_p13 = scmp.lt.s32.totalorder %s2044_s10, 63  ;;  %v2358_v1 = vld [vmem:[%s3299_s1 + $0x2c] sm:$0xf0]  ;;  %v2357_v2 = vld [vmem:[%s3299_s1 + $0x24] sm:$0xf]  ;;  %v2366_v23 = vld [vmem:[%s3301_s3 + $0x38] sm:$0xff] }
  0x17   : > { %v2121_v3 = vor.u32 %v2358_v1, %v2120_v0  ;;  %v2122_v4 = vld [vmem:[%s3299_s1 + $0x30] sm:$0xf0]  ;;  %v2112_v5 = vld [vmem:[%s3299_s1] sm:$0xf]  ;;  %v2356_v6 = vld [vmem:[%s3299_s1 + $0xc] sm:$0xf0]  ;;  %899 = vmatpush.bf16.msra.mxu2 %v2366_v23 }
  0x18   : > { %s3311_s10 = smov (!%p235_p13, %s2044_s10), 63  ;;  %v2125_v7 = vor.u32 %v2357_v2, %v2122_v4  ;;  %v2355_v8 = vld [vmem:[%s3299_s1 + $0x4] sm:$0xf]  ;;  %v2114_v9 = vld [vmem:[%s3299_s1 + $0x10] sm:$0xf0]  ;;  %v2113_v10 = vor.u32 %v2356_v6, %v2112_v5  ;;  %v2374_v24 = vld [vmem:[%s3301_s3 + $0x78] sm:$0xff] }
  0x19   : > { %s2045_s11 = sshll.u32 %s3311_s10, 2  ;;  %503 = vmatpush.bf16.msra.mxu0 %v2121_v3  ;;  %v2232_v11 = vld [vmem:[%s3299_s1 + $0x28] sm:$0xf]  ;;  %v2378_v12 = vld [vmem:[%s3299_s1 + $0x34] sm:$0xf0]  ;;  %v2117_v14 = vor.u32 %v2355_v8, %v2114_v9  ;;  %988 = vmatpush.bf16.msra.mxu3 %v2374_v24  ;;  %v2365_v26 = vld [vmem:[%s3301_s3 + $0x30] sm:$0xff] }
  0x1a   : > { %s2660_s15 = scalar_lea.vmem %s3298_s0, %s2045_s11  ;;  %v2377_v13 = vld [vmem:[%s3299_s1 + $0x2c] sm:$0xf]  ;;  %592 = vmatpush.bf16.msra.mxu1 %v2125_v7  ;;  %v2233_v15 = vor.u32 %v2378_v12, %v2232_v11  ;;  %v2234_v16 = vld [vmem:[%s3299_s1 + $0x38] sm:$0xf0]  ;;  %v2373_v27 = vld [vmem:[%s3301_s3 + $0x70] sm:$0xff]  ;;  %s231_s26 = sand.u32 1, %s2537_s19  }
  0x1b   : > { %v2237_v17 = vor.u32 %v2377_v13, %v2234_v16  ;;  %v2675_v18 = vld [vmem:[%s2660_s15] sm:$0xff]  ;;  %v2682_v19 = vld [vmem:[%s2660_s15 + $0x8] sm:$0xff]  ;;  %v2689_v20 = vld [vmem:[%s2660_s15 + $0x10] sm:$0xff]  ;;  %900 = vmatpush.bf16.msra.mxu2 %v2365_v26  ;;  %s2043_s30 = sshll.u32 %s231_s26, 8  ;;  %s2395_s7 = sshll.u32 %s2601_s22, 8 }
  0x1c   : > { %v2696_v21 = vld [vmem:[%s2660_s15 + $0x18] sm:$0xff]  ;;  %v2703_v22 = vld [vmem:[%s2660_s15 + $0x20] sm:$0xff]  ;;  %v2716_v25 = vld [vmem:[%s2660_s15 + $0x28] sm:$0xff]  ;;  %s1959_s10 = scalar_lea.hbm %s3303_s5, %s2395_s7  ;;  %s1948_s22 = scalar_lea.sflag [#allocation5], %s231_s26 }
  0x1d   : > { %504 = vmatpush.bf16.msra.mxu0 %v2113_v10  ;;  %989 = vmatpush.bf16.msra.mxu3 %v2373_v27  ;;  %v2364_v28 = vld [vmem:[%s3301_s3 + $0x28] sm:$0xff]  ;;  %v2363_v30 = vld [vmem:[%s3301_s3 + $0x20] sm:$0xff]  ;;  %v2741_v32 = vld [vmem:[%s2660_s15 + $0x30] sm:$0xff]  ;;  %s1962_s13 = sshll.u32 %s1959_s10, 4  ;;  %s2499_s25 = scalar_lea.hbm %s3303_s5, 512  ;;  %s1963_s13 = int_to_ptr.hbm [resolvable:$true] %s1962_s13 }
  0x1e   : > { %593 = vmatpush.bf16.msra.mxu1 %v2117_v14  ;;  %v2372_v29 = vld [vmem:[%s3301_s3 + $0x68] sm:$0xff]  ;;  %v2371_v31 = vld [vmem:[%s3301_s3 + $0x60] sm:$0xff]  ;;  %v2362_v33 = vld [vmem:[%s3301_s3 + $0x18] sm:$0xff]  ;;  %s2493_s14 = sshra.s32 %s1963_s13, 4  ;;  %s2494_s14 = int_to_ptr.hbm [resolvable:$true] %s2493_s14 }
  0x1f   : > { %901 = vmatpush.bf16.msra.mxu2 %v2364_v28  ;;  %v2370_v34 = vld [vmem:[%s3301_s3 + $0x58] sm:$0xff]  ;;  %v2361_v35 = vld [vmem:[%s3301_s3 + $0x10] sm:$0xff]  ;;  %v2224_v37 = vld [vmem:[%s3299_s1 + $0x8] sm:$0xf]  ;;  %s2495_s16 = scalar_lea.hbm %s2494_s14, 256  ;;  %p2500_p3 = scmp.lt.s32.totalorder %s2494_s14, %s3303_s5 }
  0x20   : > { %2126 = vmatmul.msk.bf16.vlgmr.msra.gmra.mxu0 %vm448_vm0, %v2675_v18  ;;  %v2369_v36 = vld [vmem:[%s3301_s3 + $0x50] sm:$0xff]  ;;  %v2376_v38 = vld [vmem:[%s3299_s1 + $0x14] sm:$0xf0]  ;;  %v2375_v39 = vld [vmem:[%s3299_s1 + $0xc] sm:$0xf]  ;;  %p2496_p0 = scmp.ne.s32.totalorder %s2494_s14, %s2495_s16  ;;  %p2501_p4 = scmp.lt.s32.totalorder %s2499_s25, %s2495_s16 }
  0x21   : > { %1209 = vmatpush.bf16.msrb.mxu0 %v2233_v15  ;;  %2142 = vmatmul.msk.bf16.vlgmr.msra.gmra.mxu1 %vm448_vm0, %v2675_v18  ;;  %v2225_v40 = vor.u32 %v2376_v38, %v2224_v37  ;;  %v2226_v41 = vld [vmem:[%s3299_s1 + $0x18] sm:$0xf0]  ;;  %v2360_v43 = vld [vmem:[%s3301_s3 + $0x8] sm:$0xff]  ;;  %v2359_v45 = vld [vmem:[%s3301_s3] sm:$0xff] }
  0x22   : > { %1298 = vmatpush.bf16.msrb.mxu1 %v2237_v17  ;;  %990 = vmatpush.bf16.msra.mxu3 %v2372_v29  ;;  %v2229_v42 = vor.u32 %v2375_v39, %v2226_v41  ;;  %v2368_v44 = vld [vmem:[%s3301_s3 + $0x48] sm:$0xff]  ;;  %v2367_v46 = vld [vmem:[%s3301_s3 + $0x40] sm:$0xff]  ;;  %v2784_v47 = vld [vmem:[%s2660_s15 + $0x38] sm:$0xff]  ;;  %p2497_p1 = pnand %p2496_p0, %p2618_p5  ;;  %p2502_p7 = por %p2501_p4, %p2500_p3 }
  0x23   : > { %902 = vmatpush.bf16.msra.mxu2 %v2363_v30  ;;  %v2386_v48 = vld [vmem:[%s3301_s3 + $0xb8] sm:$0xff]  ;;  %v2797_v50 = vld [vmem:[%s2660_s15 + $0x40] sm:$0xff]  ;;  %v2812_v4 = vld [vmem:[%s2660_s15 + $0x48] sm:$0xff] }
  0x24   : > { %v2394_v49 = vld [vmem:[%s3301_s3 + $0xf8] sm:$0xff]  ;;  %v310_v51 = vld [vmem:[#allocation3] sm:$0x3]  ;;  %v2385_v6 = vld [vmem:[%s3301_s3 + $0xb0] sm:$0xff]  ;;  %p2498_p2 = pneg %p2497_p1 }
  0x25   : > { %1210 = vmatpush.bf16.msrb.mxu0 %v2225_v40  ;;  %v2799_v54 = vperm.slane %v310_v51, 0  ;;  %v2803_v55 = vperm.slane %v310_v51, 1  ;;  %v2393_v7 = vld [vmem:[%s3301_s3 + $0xf0] sm:$0xff] }
  0x26   : > { %991 = vmatpush.bf16.msra.mxu3 %v2371_v31  ;;  %1299 = vmatpush.bf16.msrb.mxu1 %v2229_v42  ;;  %v2829_v27 = vld [vmem:[%s2660_s15 + $0x50] sm:$0xff]  ;;  %p2503_p8 = pnand %p2502_p7, %p2498_p2 }
  0x27   : > { %903 = vmatpush.bf16.msra.mxu2 %v2362_v33 }
  0x2a   : > { %992 = vmatpush.bf16.msra.mxu3 %v2370_v34 }
  0x2b   : > { %904 = vmatpush.bf16.msra.mxu2 %v2361_v35 }
  0x2e   : > { %993 = vmatpush.bf16.msra.mxu3 %v2369_v36 }
  0x2f   : > { %905 = vmatpush.bf16.msra.mxu2 %v2360_v43  ;;  %v2840_v43 = vld [vmem:[%s2660_s15 + $0x58] sm:$0xff] }
  0x30   : > { %2127 = vmatmul.msk.bf16.gmra.mxu0 %vm448_vm0, %v2682_v19 }
  0x31   : > { %2143 = vmatmul.msk.bf16.gmra.mxu1 %vm448_vm0, %v2682_v19 }
  0x32   : > { %994 = vmatpush.bf16.msra.mxu3 %v2368_v44 }
  0x33   : > { %906 = vmatpush.bf16.msra.mxu2 %v2359_v45  ;;  %v2384_v45 = vld [vmem:[%s3301_s3 + $0xa8] sm:$0xff] }
  0x36   : > { %995 = vmatpush.bf16.msra.mxu3 %v2367_v46  ;;  %v2392_v46 = vld [vmem:[%s3301_s3 + $0xe8] sm:$0xff] }
  0x37   : > { %1605 = vmatpush.bf16.msrb.mxu2 %v2386_v48 }
  0x3a   : > { %1694 = vmatpush.bf16.msrb.mxu3 %v2394_v49 }
  0x3b   : > { %1606 = vmatpush.bf16.msrb.mxu2 %v2385_v6 }
  0x3e   : > { %1695 = vmatpush.bf16.msrb.mxu3 %v2393_v7 }
  0x3f   : > { %1607 = vmatpush.bf16.msrb.mxu2 %v2384_v45 }
  0x40   : > { %2128 = vmatmul.msk.bf16.gmra.mxu0 %vm448_vm0, %v2689_v20 }
  0x41   : > { %2144 = vmatmul.msk.bf16.gmra.mxu1 %vm448_vm0, %v2689_v20 }
  0x42   : > { %1696 = vmatpush.bf16.msrb.mxu3 %v2392_v46 }
  0x50   : > { %2129 = vmatmul.msk.bf16.gmra.mxu0 %vm448_vm0, %v2696_v21 }
  0x51   : > { %2145 = vmatmul.msk.bf16.gmra.mxu1 %vm448_vm0, %v2696_v21 }
  0x60   : > { %2130 = vmatmul.msk.bf16.gmra.mxu0 %vm448_vm0, %v2703_v22 }
  0x61   : > { %2146 = vmatmul.msk.bf16.gmra.mxu1 %vm448_vm0, %v2703_v22 }
  0x70   : > { %2131 = vmatmul.msk.bf16.gmra.mxu0 %vm448_vm0, %v2716_v25 }
  0x71   : > { %2147 = vmatmul.msk.bf16.gmra.mxu1 %vm448_vm0, %v2716_v25 }
  0x80   : > { %2132 = vmatmul.msk.bf16.gmra.mxu0 %vm448_vm0, %v2741_v32 }
  0x81   : > { %2148 = vmatmul.msk.bf16.gmra.mxu1 %vm448_vm0, %v2741_v32 }
  0x90   : > { %2133 = vmatmul.msk.bf16.gmra.mxu0 %vm448_vm0, %v2784_v47 }
  0x91   : > { %2149 = vmatmul.msk.bf16.gmra.mxu1 %vm448_vm0, %v2784_v47 }
  0x9d   : > { %v506_v52 = vpop.f32.mrf.mxu0 }
  0x9e   : > { %v595_v53 = vpop.f32.mrf.mxu1  ;;  %v507_v56 = vadd.f32 %v506_v52, %v2799_v54 }
  0x9f   : > { %v596_v57 = vadd.f32 %v595_v53, %v2803_v55 }
  0xa0   : > { %2134 = vmatmul.msk.bf16.gmra.mxu0 %vm448_vm0, %v2797_v50  ;;  %v675_v62 = vmax.f32 %v507_v56, 0.0 }
  0xa1   : > { %2150 = vmatmul.msk.bf16.gmra.mxu1 %vm448_vm0, %v2797_v50  ;;  %v676_v0 = vmax.f32 %v596_v57, 0.0 }
  0xa5   : > { %v508_v58 = vpop.f32.mrf.mxu0 }
  0xa6   : > { %v509_v59 = vadd.f32 %v508_v58, %v2799_v54  ;;  %v597_v60 = vpop.f32.mrf.mxu1 }
  0xa7   : > { %v598_v61 = vadd.f32 %v597_v60, %v2803_v55 }
  0xa8   : > { %v677_v63 = vmax.f32 %v509_v59, 0.0 }
  0xa9   : > { %v678_v1 = vmax.f32 %v598_v61, 0.0 }
  0xaa   : > { %v771_v2 = vpack.c.bf16 %v677_v63, %v675_v62 }
  0xab   : > { %v772_v3 = vpack.c.bf16 %v678_v1, %v676_v0  ;;  %v2857_v0 = vld [vmem:[%s2660_s15 + $0x60] sm:$0xff] }
  0xac   : > { %907 = vmatmul.bf16.vlgmr.msra.gmra.mxu2 %v771_v2 }
  0xad   : > { %996 = vmatmul.bf16.vlgmr.msra.gmra.mxu3 %v772_v3  ;;  %v511_v5 = vpop.f32.mrf.mxu0 }
  0xae   : > { %v600_v8 = vpop.f32.mrf.mxu1  ;;  %v512_v9 = vadd.f32 %v511_v5, %v2799_v54 }
  0xaf   : > { %v601_v10 = vadd.f32 %v600_v8, %v2803_v55 }
  0xb0   : > { %2135 = vmatmul.msk.bf16.gmra.mxu0 %vm448_vm0, %v2812_v4  ;;  %v679_v15 = vmax.f32 %v512_v9, 0.0 }
  0xb1   : > { %2151 = vmatmul.msk.bf16.gmra.mxu1 %vm448_vm0, %v2812_v4  ;;  %v680_v17 = vmax.f32 %v601_v10, 0.0 }
  0xb5   : > { %v513_v11 = vpop.f32.mrf.mxu0 }
  0xb6   : > { %v514_v12 = vadd.f32 %v513_v11, %v2799_v54  ;;  %v602_v13 = vpop.f32.mrf.mxu1 }
  0xb7   : > { %v603_v14 = vadd.f32 %v602_v13, %v2803_v55 }
  0xb8   : > { %v681_v16 = vmax.f32 %v514_v12, 0.0 }
  0xb9   : > { %v682_v23 = vmax.f32 %v603_v14, 0.0 }
  0xba   : > { %v773_v24 = vpack.c.bf16 %v681_v16, %v679_v15  ;;  %v2868_v16 = vld [vmem:[%s2660_s15 + $0x68] sm:$0xff] }
  0xbb   : > { %v774_v26 = vpack.c.bf16 %v682_v23, %v680_v17  ;;  %v2383_v23 = vld [vmem:[%s3301_s3 + $0xa0] sm:$0xff] }
  0xbc   : > { %912 = vmatmul.bf16.gmra.mxu2 %v773_v24  ;;  %v2391_v24 = vld [vmem:[%s3301_s3 + $0xe0] sm:$0xff] }
  0xbd   : > { %1001 = vmatmul.bf16.gmra.mxu3 %v774_v26  ;;  %v516_v28 = vpop.f32.mrf.mxu0  ;;  %1608 = vmatpush.bf16.msrb.mxu2 %v2383_v23 }
  0xbe   : > { %v605_v29 = vpop.f32.mrf.mxu1  ;;  %v517_v30 = vadd.f32 %v516_v28, %v2799_v54  ;;  %1697 = vmatpush.bf16.msrb.mxu3 %v2391_v24 }
  0xbf   : > { %v606_v31 = vadd.f32 %v605_v29, %v2803_v55 }
  0xc0   : > { %2136 = vmatmul.msk.bf16.gmra.mxu0 %vm448_vm0, %v2829_v27  ;;  %v683_v37 = vmax.f32 %v517_v30, 0.0 }
  0xc1   : > { %2152 = vmatmul.msk.bf16.gmra.mxu1 %vm448_vm0, %v2829_v27  ;;  %v684_v39 = vmax.f32 %v606_v31, 0.0 }
  0xc5   : > { %v518_v33 = vpop.f32.mrf.mxu0 }
  0xc6   : > { %v519_v34 = vadd.f32 %v518_v33, %v2799_v54  ;;  %v607_v35 = vpop.f32.mrf.mxu1 }
  0xc7   : > { %v608_v36 = vadd.f32 %v607_v35, %v2803_v55 }
  0xc8   : > { %v685_v38 = vmax.f32 %v519_v34, 0.0 }
  0xc9   : > { %v686_v40 = vmax.f32 %v608_v36, 0.0 }
  0xca   : > { %v775_v41 = vpack.c.bf16 %v685_v38, %v683_v37 }
  0xcb   : > { %v776_v42 = vpack.c.bf16 %v686_v40, %v684_v39 }
  0xcc   : > { %917 = vmatmul.bf16.gmra.mxu2 %v775_v41  ;;  %v2885_v41 = vld [vmem:[%s2660_s15 + $0x70] sm:$0xff] }
  0xcd   : > { %1006 = vmatmul.bf16.gmra.mxu3 %v776_v42  ;;  %v521_v44 = vpop.f32.mrf.mxu0 }
  0xce   : > { %v610_v48 = vpop.f32.mrf.mxu1  ;;  %v522_v49 = vadd.f32 %v521_v44, %v2799_v54 }
  0xcf   : > { %v611_v51 = vadd.f32 %v610_v48, %v2803_v55 }
  0xd0   : > { %2137 = vmatmul.msk.bf16.gmra.mxu0 %vm448_vm0, %v2840_v43  ;;  %v687_v58 = vmax.f32 %v522_v49, 0.0 }
  0xd1   : > { %2153 = vmatmul.msk.bf16.gmra.mxu1 %vm448_vm0, %v2840_v43  ;;  %v688_v60 = vmax.f32 %v611_v51, 0.0 }
  0xd5   : > { %v523_v52 = vpop.f32.mrf.mxu0 }
  0xd6   : > { %v524_v53 = vadd.f32 %v523_v52, %v2799_v54  ;;  %v612_v56 = vpop.f32.mrf.mxu1 }
  0xd7   : > { %v613_v57 = vadd.f32 %v612_v56, %v2803_v55 }
  0xd8   : > { %v689_v59 = vmax.f32 %v524_v53, 0.0 }
  0xd9   : > { %v690_v61 = vmax.f32 %v613_v57, 0.0 }
  0xda   : > { %v777_v62 = vpack.c.bf16 %v689_v59, %v687_v58 }
  0xdb   : > { %v778_v63 = vpack.c.bf16 %v690_v61, %v688_v60  ;;  %v2896_v61 = vld [vmem:[%s2660_s15 + $0x78] sm:$0xff]  ;;  %s3143_s15 = scalar_lea.vmem [#allocation6], %s2043_s30 }
  0xdc   : > { %922 = vmatmul.bf16.gmra.mxu2 %v777_v62  ;;  %s1960_s12 = sshll.u32 %s3143_s15, 4  ;;  %s1961_s12 = int_to_ptr.vmem [resolvable:$true] %s1960_s12 }
  0xdd   : > { %1011 = vmatmul.bf16.gmra.mxu3 %v778_v63  ;;  %v526_v1 = vpop.f32.mrf.mxu0  ;;  %v2382_v63 = vld [vmem:[%s3301_s3 + $0x98] sm:$0xff] }
  0xde   : > { %v615_v2 = vpop.f32.mrf.mxu1  ;;  %v527_v3 = vadd.f32 %v526_v1, %v2799_v54  ;;  %v2390_v1 = vld [vmem:[%s3301_s3 + $0xd8] sm:$0xff]  ;;  %1609 = vmatpush.bf16.msrb.mxu2 %v2382_v63 }
  0xdf   : > { %v616_v5 = vadd.f32 %v615_v2, %v2803_v55  ;;  %1698 = vmatpush.bf16.msrb.mxu3 %v2390_v1 }
  0xe0   : > { %2138 = vmatmul.msk.bf16.gmra.mxu0 %vm448_vm0, %v2857_v0  ;;  %v691_v10 = vmax.f32 %v527_v3, 0.0 }
  0xe1   : > { %2154 = vmatmul.msk.bf16.gmra.mxu1 %vm448_vm0, %v2857_v0  ;;  %v692_v12 = vmax.f32 %v616_v5, 0.0 }
  0xe5   : > { %v528_v6 = vpop.f32.mrf.mxu0 }
  0xe6   : > { %v529_v7 = vadd.f32 %v528_v6, %v2799_v54  ;;  %v617_v8 = vpop.f32.mrf.mxu1 }
  0xe7   : > { %v618_v9 = vadd.f32 %v617_v8, %v2803_v55 }
  0xe8   : > { %v693_v11 = vmax.f32 %v529_v7, 0.0 }
  0xe9   : > { %v694_v13 = vmax.f32 %v618_v9, 0.0 }
  0xea   : > { %v779_v14 = vpack.c.bf16 %v693_v11, %v691_v10 }
  0xeb   : > { %v780_v15 = vpack.c.bf16 %v694_v13, %v692_v12 }
  0xec   : > { %927 = vmatmul.bf16.gmra.mxu2 %v779_v14 }
  0xed   : > { %1016 = vmatmul.bf16.gmra.mxu3 %v780_v15  ;;  %v531_v17 = vpop.f32.mrf.mxu0 }
  0xee   : > { %v620_v26 = vpop.f32.mrf.mxu1  ;;  %v532_v28 = vadd.f32 %v531_v17, %v2799_v54 }
  0xef   : > { %v621_v29 = vadd.f32 %v620_v26, %v2803_v55 }
  0xf0   : > { %2139 = vmatmul.msk.bf16.gmra.mxu0 %vm448_vm0, %v2868_v16  ;;  %v695_v35 = vmax.f32 %v532_v28, 0.0 }
  0xf1   : > { %2155 = vmatmul.msk.bf16.gmra.mxu1 %vm448_vm0, %v2868_v16  ;;  %v696_v37 = vmax.f32 %v621_v29, 0.0 }
  0xf5   : > { %v533_v30 = vpop.f32.mrf.mxu0 }
  0xf6   : > { %v534_v31 = vadd.f32 %v533_v30, %v2799_v54  ;;  %v622_v33 = vpop.f32.mrf.mxu1 }
  0xf7   : > { %v623_v34 = vadd.f32 %v622_v33, %v2803_v55 }
  0xf8   : > { %v697_v36 = vmax.f32 %v534_v31, 0.0 }
  0xf9   : > { %v698_v38 = vmax.f32 %v623_v34, 0.0 }
  0xfa   : > { %v781_v39 = vpack.c.bf16 %v697_v36, %v695_v35 }
  0xfb   : > { %v782_v40 = vpack.c.bf16 %v698_v38, %v696_v37 }
  0xfc   : > { %932 = vmatmul.bf16.gmra.mxu2 %v781_v39 }
  0xfd   : > { %1021 = vmatmul.bf16.gmra.mxu3 %v782_v40  ;;  %v536_v42 = vpop.f32.mrf.mxu0  ;;  %v2389_v40 = vld [vmem:[%s3301_s3 + $0xd0] sm:$0xff] }
  0xfe   : > { %v625_v44 = vpop.f32.mrf.mxu1  ;;  %v537_v45 = vadd.f32 %v536_v42, %v2799_v54  ;;  %1699 = vmatpush.bf16.msrb.mxu3 %v2389_v40 }
  0xff   : > { %v626_v46 = vadd.f32 %v625_v44, %v2803_v55 }
 0x100   : > { %2140 = vmatmul.msk.bf16.gmra.mxu0 %vm448_vm0, %v2885_v41  ;;  %v699_v53 = vmax.f32 %v537_v45, 0.0 }
 0x101   : > { %2156 = vmatmul.msk.bf16.gmra.mxu1 %vm448_vm0, %v2885_v41  ;;  %v700_v57 = vmax.f32 %v626_v46, 0.0 }
 0x105   : > { %v538_v48 = vpop.f32.mrf.mxu0 }
 0x106   : > { %v539_v49 = vadd.f32 %v538_v48, %v2799_v54  ;;  %v627_v51 = vpop.f32.mrf.mxu1 }
 0x107   : > { %v628_v52 = vadd.f32 %v627_v51, %v2803_v55 }
 0x108   : > { %v701_v56 = vmax.f32 %v539_v49, 0.0 }
 0x109   : > { %v702_v58 = vmax.f32 %v628_v52, 0.0 }
 0x10a   : > { %v783_v59 = vpack.c.bf16 %v701_v56, %v699_v53 }
 0x10b   : > { %v784_v60 = vpack.c.bf16 %v702_v58, %v700_v57 }
 0x10c   : > { %937 = vmatmul.bf16.gmra.mxu2 %v783_v59 }
 0x10d   : > { %1026 = vmatmul.bf16.gmra.mxu3 %v784_v60  ;;  %v541_v62 = vpop.f32.mrf.mxu0 }
 0x10e   : > { %v630_v2 = vpop.f32.mrf.mxu1  ;;  %v542_v3 = vadd.f32 %v541_v62, %v2799_v54 }
 0x10f   : > { %v631_v5 = vadd.f32 %v630_v2, %v2803_v55 }
 0x110   : > { %2141 = vmatmul.msk.bf16.gmra.mxu0 %vm448_vm0, %v2896_v61  ;;  %v703_v10 = vmax.f32 %v542_v3, 0.0 }
 0x111   : > { %2157 = vmatmul.msk.bf16.gmra.mxu1 %vm448_vm0, %v2896_v61  ;;  %v704_v12 = vmax.f32 %v631_v5, 0.0 }
 0x115   : > { %v543_v6 = vpop.f32.mrf.mxu0 }
 0x116   : > { %v544_v7 = vadd.f32 %v543_v6, %v2799_v54  ;;  %v632_v8 = vpop.f32.mrf.mxu1 }
 0x117   : > { %v633_v9 = vadd.f32 %v632_v8, %v2803_v55 }
 0x118   : > { %v705_v11 = vmax.f32 %v544_v7, 0.0 }
 0x119   : > { %v706_v13 = vmax.f32 %v633_v9, 0.0 }
 0x11a   : > { %v785_v14 = vpack.c.bf16 %v705_v11, %v703_v10 }
 0x11b   : > { %v786_v15 = vpack.c.bf16 %v706_v13, %v704_v12 }
 0x11c   : > { %942 = vmatmul.bf16.gmra.mxu2 %v785_v14 }
 0x11d   : > { %1031 = vmatmul.bf16.gmra.mxu3 %v786_v15  ;;  %v546_v17 = vpop.f32.mrf.mxu0 }
 0x11e   : > { %v635_v23 = vpop.f32.mrf.mxu1  ;;  %v547_v24 = vadd.f32 %v546_v17, %v2799_v54 }
 0x11f   : > { %v636_v26 = vadd.f32 %v635_v23, %v2803_v55 }
 0x120   : > { %2238 = vmatmul.msk.bf16.vlgmr.msrb.gmra.mxu0 %vm448_vm0, %v2675_v18  ;;  %v707_v33 = vmax.f32 %v547_v24, 0.0 }
 0x121   : > { %2254 = vmatmul.msk.bf16.vlgmr.msrb.gmra.mxu1 %vm448_vm0, %v2675_v18  ;;  %v708_v35 = vmax.f32 %v636_v26, 0.0  ;;  %v2381_v18 = vld [vmem:[%s3301_s3 + $0x90] sm:$0xff] }
 0x122   : > { %1610 = vmatpush.bf16.msrb.mxu2 %v2381_v18 }
 0x125   : > { %v548_v28 = vpop.f32.mrf.mxu0 }
 0x126   : > { %v549_v29 = vadd.f32 %v548_v28, %v2799_v54  ;;  %v637_v30 = vpop.f32.mrf.mxu1 }
 0x127   : > { %v638_v31 = vadd.f32 %v637_v30, %v2803_v55 }
 0x128   : > { %v709_v34 = vmax.f32 %v549_v29, 0.0 }
 0x129   : > { %v710_v36 = vmax.f32 %v638_v31, 0.0 }
 0x12a   : > { %v787_v37 = vpack.c.bf16 %v709_v34, %v707_v33  ;;  %v2380_v33 = vld [vmem:[%s3301_s3 + $0x88] sm:$0xff] }
 0x12b   : > { %v788_v38 = vpack.c.bf16 %v710_v36, %v708_v35  ;;  %v2388_v34 = vld [vmem:[%s3301_s3 + $0xc8] sm:$0xff]  ;;  %1611 = vmatpush.bf16.msrb.mxu2 %v2380_v33 }
 0x12c   : > { %947 = vmatmul.bf16.gmra.mxu2 %v787_v37  ;;  %1700 = vmatpush.bf16.msrb.mxu3 %v2388_v34 }
 0x12d   : > { %1036 = vmatmul.bf16.gmra.mxu3 %v788_v38  ;;  %v551_v39 = vpop.f32.mrf.mxu0 }
 0x12e   : > { %v640_v42 = vpop.f32.mrf.mxu1  ;;  %v552_v48 = vadd.f32 %v551_v39, %v2799_v54 }
 0x12f   : > { %v908_v44 = vpop.f32.mrf.mxu2  ;;  %v641_v49 = vadd.f32 %v640_v42, %v2803_v55 }
 0x130   : > { %v997_v45 = vpop.f32.mrf.mxu3  ;;  %2239 = vmatmul.msk.bf16.gmra.mxu0 %vm448_vm0, %v2682_v19  ;;  %v711_v58 = vmax.f32 %v552_v48, 0.0 }
 0x131   : > { %v2928_v46 = vadd.f32 %v997_v45, %v908_v44  ;;  %2255 = vmatmul.msk.bf16.gmra.mxu1 %vm448_vm0, %v2682_v19  ;;  %v712_v62 = vmax.f32 %v641_v49, 0.0 }
 0x135   : > { %v553_v51 = vpop.f32.mrf.mxu0 }
 0x136   : > { %v554_v52 = vadd.f32 %v553_v51, %v2799_v54  ;;  %v642_v53 = vpop.f32.mrf.mxu1 }
 0x137   : > { %v643_v56 = vadd.f32 %v642_v53, %v2803_v55  ;;  %v910_v57 = vpop.f32.mrf.mxu2 }
 0x138   : > { %v713_v59 = vmax.f32 %v554_v52, 0.0  ;;  %v999_v60 = vpop.f32.mrf.mxu3 }
 0x139   : > { %v714_v63 = vmax.f32 %v643_v56, 0.0  ;;  %v2936_v1 = vadd.f32 %v999_v60, %v910_v57 }
 0x13a   : > { %v789_v2 = vpack.c.bf16 %v713_v59, %v711_v58 }
 0x13b   : > { %v790_v19 = vpack.c.bf16 %v714_v63, %v712_v62 }
 0x13c   : > { %952 = vmatmul.bf16.gmra.mxu2 %v789_v2 }
 0x13d   : > { %1041 = vmatmul.bf16.gmra.mxu3 %v790_v19  ;;  %v556_v3 = vpop.f32.mrf.mxu0 }
 0x13e   : > { %v645_v5 = vpop.f32.mrf.mxu1  ;;  %v557_v9 = vadd.f32 %v556_v3, %v2799_v54 }
 0x13f   : > { %v913_v6 = vpop.f32.mrf.mxu2  ;;  %v646_v10 = vadd.f32 %v645_v5, %v2803_v55 }
 0x140   : > { %v1002_v7 = vpop.f32.mrf.mxu3  ;;  %2240 = vmatmul.msk.bf16.gmra.mxu0 %vm448_vm0, %v2689_v20  ;;  %v715_v17 = vmax.f32 %v557_v9, 0.0 }
 0x141   : > { %v2940_v8 = vadd.f32 %v1002_v7, %v913_v6  ;;  %2256 = vmatmul.msk.bf16.gmra.mxu1 %vm448_vm0, %v2689_v20  ;;  %v716_v26 = vmax.f32 %v646_v10, 0.0 }
 0x145   : > { %v558_v11 = vpop.f32.mrf.mxu0 }
 0x146   : > { %v559_v12 = vadd.f32 %v558_v11, %v2799_v54  ;;  %v647_v13 = vpop.f32.mrf.mxu1 }
 0x147   : > { %v648_v14 = vadd.f32 %v647_v13, %v2803_v55  ;;  %v915_v15 = vpop.f32.mrf.mxu2 }
 0x148   : > { %v717_v23 = vmax.f32 %v559_v12, 0.0  ;;  %v1004_v24 = vpop.f32.mrf.mxu3 }
 0x149   : > { %v718_v28 = vmax.f32 %v648_v14, 0.0  ;;  %v2948_v29 = vadd.f32 %v1004_v24, %v915_v15 }
 0x14a   : > { %v791_v30 = vpack.c.bf16 %v717_v23, %v715_v17 }
 0x14b   : > { %v792_v20 = vpack.c.bf16 %v718_v28, %v716_v26  ;;  %v2379_v26 = vld [vmem:[%s3301_s3 + $0x80] sm:$0xff] }
 0x14c   : > { %957 = vmatmul.bf16.gmra.mxu2 %v791_v30  ;;  %v2387_v28 = vld [vmem:[%s3301_s3 + $0xc0] sm:$0xff] }
 0x14d   : > { %1046 = vmatmul.bf16.gmra.mxu3 %v792_v20  ;;  %v561_v31 = vpop.f32.mrf.mxu0  ;;  %1612 = vmatpush.bf16.msrb.mxu2 %v2379_v26 }
 0x14e   : > { %v650_v35 = vpop.f32.mrf.mxu1  ;;  %v562_v39 = vadd.f32 %v561_v31, %v2799_v54  ;;  %1701 = vmatpush.bf16.msrb.mxu3 %v2387_v28 }
 0x14f   : > { %v918_v36 = vpop.f32.mrf.mxu2  ;;  %v651_v18 = vadd.f32 %v650_v35, %v2803_v55 }
 0x150   : > { %v1007_v37 = vpop.f32.mrf.mxu3  ;;  %2241 = vmatmul.msk.bf16.gmra.mxu0 %vm448_vm0, %v2696_v21  ;;  %v719_v49 = vmax.f32 %v562_v39, 0.0 }
 0x151   : > { %v2958_v38 = vadd.f32 %v1007_v37, %v918_v36  ;;  %2257 = vmatmul.msk.bf16.gmra.mxu1 %vm448_vm0, %v2696_v21  ;;  %v720_v53 = vmax.f32 %v651_v18, 0.0 }
 0x155   : > { %v563_v40 = vpop.f32.mrf.mxu0 }
 0x156   : > { %v564_v42 = vadd.f32 %v563_v40, %v2799_v54  ;;  %v652_v44 = vpop.f32.mrf.mxu1 }
 0x157   : > { %v653_v45 = vadd.f32 %v652_v44, %v2803_v55  ;;  %v920_v48 = vpop.f32.mrf.mxu2 }
 0x158   : > { %v721_v51 = vmax.f32 %v564_v42, 0.0  ;;  %v1009_v52 = vpop.f32.mrf.mxu3 }
 0x159   : > { %v722_v56 = vmax.f32 %v653_v45, 0.0  ;;  %v2966_v57 = vadd.f32 %v1009_v52, %v920_v48 }
 0x15a   : > { %v793_v58 = vpack.c.bf16 %v721_v51, %v719_v49 }
 0x15b   : > { %v794_v21 = vpack.c.bf16 %v722_v56, %v720_v53 }
 0x15c   : > { %962 = vmatmul.bf16.gmra.mxu2 %v793_v58 }
 0x15d   : > { %1051 = vmatmul.bf16.gmra.mxu3 %v794_v21  ;;  %v566_v59 = vpop.f32.mrf.mxu0 }
 0x15e   : > { %v655_v60 = vpop.f32.mrf.mxu1  ;;  %v567_v19 = vadd.f32 %v566_v59, %v2799_v54 }
 0x15f   : > { %v923_v62 = vpop.f32.mrf.mxu2  ;;  %v656_v3 = vadd.f32 %v655_v60, %v2803_v55 }
 0x160   : > { %v1012_v63 = vpop.f32.mrf.mxu3  ;;  %2242 = vmatmul.msk.bf16.gmra.mxu0 %vm448_vm0, %v2703_v22  ;;  %v723_v11 = vmax.f32 %v567_v19, 0.0 }
 0x161   : > { %v2970_v2 = vadd.f32 %v1012_v63, %v923_v62  ;;  %2258 = vmatmul.msk.bf16.gmra.mxu1 %vm448_vm0, %v2703_v22  ;;  %v724_v14 = vmax.f32 %v656_v3, 0.0 }
 0x165   : > { %v568_v5 = vpop.f32.mrf.mxu0 }
 0x166   : > { %v569_v6 = vadd.f32 %v568_v5, %v2799_v54  ;;  %v657_v7 = vpop.f32.mrf.mxu1 }
 0x167   : > { %v658_v9 = vadd.f32 %v657_v7, %v2803_v55  ;;  %v925_v10 = vpop.f32.mrf.mxu2 }
 0x168   : > { %v725_v12 = vmax.f32 %v569_v6, 0.0  ;;  %v1014_v13 = vpop.f32.mrf.mxu3 }
 0x169   : > { %v726_v15 = vmax.f32 %v658_v9, 0.0  ;;  %v2978_v17 = vadd.f32 %v1014_v13, %v925_v10 }
 0x16a   : > { %v795_v23 = vpack.c.bf16 %v725_v12, %v723_v11 }
 0x16b   : > { %v796_v22 = vpack.c.bf16 %v726_v15, %v724_v14 }
 0x16c   : > { %967 = vmatmul.bf16.gmra.mxu2 %v795_v23 }
 0x16d   : > { %1056 = vmatmul.bf16.gmra.mxu3 %v796_v22  ;;  %v571_v24 = vpop.f32.mrf.mxu0 }
 0x16e   : > { %v660_v30 = vpop.f32.mrf.mxu1  ;;  %v572_v34 = vadd.f32 %v571_v24, %v2799_v54 }
 0x16f   : > { %v928_v20 = vpop.f32.mrf.mxu2  ;;  %v661_v35 = vadd.f32 %v660_v30, %v2803_v55 }
 0x170   : > { %v1017_v31 = vpop.f32.mrf.mxu3  ;;  %2243 = vmatmul.msk.bf16.gmra.mxu0 %vm448_vm0, %v2716_v25  ;;  %v727_v42 = vmax.f32 %v572_v34, 0.0 }
 0x171   : > { %v2988_v33 = vadd.f32 %v1017_v31, %v928_v20  ;;  %2259 = vmatmul.msk.bf16.gmra.mxu1 %vm448_vm0, %v2716_v25  ;;  %v728_v48 = vmax.f32 %v661_v35, 0.0 }
 0x175   : > { %v573_v36 = vpop.f32.mrf.mxu0 }
 0x176   : > { %v574_v37 = vadd.f32 %v573_v36, %v2799_v54  ;;  %v662_v39 = vpop.f32.mrf.mxu1 }
 0x177   : > { %v663_v18 = vadd.f32 %v662_v39, %v2803_v55  ;;  %v930_v40 = vpop.f32.mrf.mxu2 }
 0x178   : > { %v729_v44 = vmax.f32 %v574_v37, 0.0  ;;  %v1019_v45 = vpop.f32.mrf.mxu3 }
 0x179   : > { %v730_v49 = vmax.f32 %v663_v18, 0.0  ;;  %v2996_v51 = vadd.f32 %v1019_v45, %v930_v40 }
 0x17a   : > { %v797_v52 = vpack.c.bf16 %v729_v44, %v727_v42 }
 0x17b   : > { %v798_v25 = vpack.c.bf16 %v730_v49, %v728_v48  ;;  %v1145_v48 = vld [vmem:[#allocation3 + $0x2] sm:$0x3] }
 0x17c   : > { %972 = vmatmul.bf16.gmra.mxu2 %v797_v52 }
 0x17d   : > { %1061 = vmatmul.bf16.gmra.mxu3 %v798_v25  ;;  %v576_v53 = vpop.f32.mrf.mxu0 }
 0x17e   : > { %v665_v56 = vpop.f32.mrf.mxu1  ;;  %v577_v60 = vadd.f32 %v576_v53, %v2799_v54 }
 0x17f   : > { %v933_v58 = vpop.f32.mrf.mxu2  ;;  %v666_v62 = vadd.f32 %v665_v56, %v2803_v55 }
 0x180   : > { %v1022_v21 = vpop.f32.mrf.mxu3  ;;  %2244 = vmatmul.msk.bf16.gmra.mxu0 %vm448_vm0, %v2741_v32  ;;  %v731_v7 = vmax.f32 %v577_v60, 0.0 }
 0x181   : > { %v3000_v59 = vadd.f32 %v1022_v21, %v933_v58  ;;  %2260 = vmatmul.msk.bf16.gmra.mxu1 %vm448_vm0, %v2741_v32  ;;  %v732_v11 = vmax.f32 %v666_v62, 0.0 }
 0x185   : > { %v578_v63 = vpop.f32.mrf.mxu0 }
 0x186   : > { %v579_v19 = vadd.f32 %v578_v63, %v2799_v54  ;;  %v667_v3 = vpop.f32.mrf.mxu1 }
 0x187   : > { %v668_v5 = vadd.f32 %v667_v3, %v2803_v55  ;;  %v935_v6 = vpop.f32.mrf.mxu2 }
 0x188   : > { %v733_v9 = vmax.f32 %v579_v19, 0.0  ;;  %v1024_v10 = vpop.f32.mrf.mxu3 }
 0x189   : > { %v734_v12 = vmax.f32 %v668_v5, 0.0  ;;  %v3008_v13 = vadd.f32 %v1024_v10, %v935_v6 }
 0x18a   : > { %v799_v14 = vpack.c.bf16 %v733_v9, %v731_v7 }
 0x18b   : > { %v800_v32 = vpack.c.bf16 %v734_v12, %v732_v11 }
 0x18c   : > { %977 = vmatmul.bf16.gmra.mxu2 %v799_v14 }
 0x18d   : > { %1066 = vmatmul.bf16.gmra.mxu3 %v800_v32  ;;  %v581_v15 = vpop.f32.mrf.mxu0 }
 0x18e   : > { %v670_v23 = vpop.f32.mrf.mxu1  ;;  %v582_v28 = vadd.f32 %v581_v15, %v2799_v54 }
 0x18f   : > { %v938_v22 = vpop.f32.mrf.mxu2  ;;  %v671_v30 = vadd.f32 %v670_v23, %v2803_v55 }
 0x190   : > { %v1027_v24 = vpop.f32.mrf.mxu3  ;;  %2245 = vmatmul.msk.bf16.gmra.mxu0 %vm448_vm0, %v2784_v47  ;;  %v735_v37 = vmax.f32 %v582_v28, 0.0 }
 0x191   : > { %v3012_v26 = vadd.f32 %v1027_v24, %v938_v22  ;;  %2261 = vmatmul.msk.bf16.gmra.mxu1 %vm448_vm0, %v2784_v47  ;;  %v736_v40 = vmax.f32 %v671_v30, 0.0 }
 0x195   : > { %v583_v20 = vpop.f32.mrf.mxu0 }
 0x196   : > { %v584_v31 = vadd.f32 %v583_v20, %v2799_v54  ;;  %v672_v34 = vpop.f32.mrf.mxu1  ;;  %v3022_v54 = vperm.slane %v1145_v48, 0 }
 0x197   : > { %v673_v35 = vadd.f32 %v672_v34, %v2803_v55  ;;  %v940_v36 = vpop.f32.mrf.mxu2  ;;  %v3026_v55 = vperm.slane %v1145_v48, 1 }
 0x198   : > { %v737_v39 = vmax.f32 %v584_v31, 0.0  ;;  %v1029_v18 = vpop.f32.mrf.mxu3 }
 0x199   : > { %v738_v42 = vmax.f32 %v673_v35, 0.0  ;;  %v3020_v44 = vadd.f32 %v1029_v18, %v940_v36 }
 0x19a   : > { %v801_v45 = vpack.c.bf16 %v737_v39, %v735_v37 }
 0x19b   : > { %v802_v47 = vpack.c.bf16 %v738_v42, %v736_v40 }
 0x19c   : > { %982 = vmatmul.bf16.gmra.mxu2 %v801_v45 }
 0x19d   : > { %1071 = vmatmul.bf16.gmra.mxu3 %v802_v47  ;;  %v1212_v49 = vpop.f32.mrf.mxu0 }
 0x19e   : > { %v1301_v52 = vpop.f32.mrf.mxu1  ;;  %v1213_v58 = vadd.f32 %v1212_v49, %v3022_v54 }
 0x19f   : > { %v943_v25 = vpop.f32.mrf.mxu2  ;;  %v1302_v21 = vadd.f32 %v1301_v52, %v3026_v55 }
 0x1a0   : > { %v1032_v53 = vpop.f32.mrf.mxu3  ;;  %2246 = vmatmul.msk.bf16.gmra.mxu0 %vm448_vm0, %v2797_v50  ;;  %v1381_v5 = vmax.f32 %v1213_v58, 0.0 }
 0x1a1   : > { %v3028_v56 = vadd.f32 %v1032_v53, %v943_v25  ;;  %2262 = vmatmul.msk.bf16.gmra.mxu1 %vm448_vm0, %v2797_v50  ;;  %v1382_v9 = vmax.f32 %v1302_v21, 0.0 }
 0x1a5   : > { %v1214_v60 = vpop.f32.mrf.mxu0 }
 0x1a6   : > { %v1215_v62 = vadd.f32 %v1214_v60, %v3022_v54  ;;  %v1303_v63 = vpop.f32.mrf.mxu1 }
 0x1a7   : > { %v1304_v19 = vadd.f32 %v1303_v63, %v3026_v55  ;;  %v945_v3 = vpop.f32.mrf.mxu2 }
 0x1a8   : > { %v1383_v6 = vmax.f32 %v1215_v62, 0.0  ;;  %v1034_v7 = vpop.f32.mrf.mxu3 }
 0x1a9   : > { %v1384_v10 = vmax.f32 %v1304_v19, 0.0  ;;  %v3036_v11 = vadd.f32 %v1034_v7, %v945_v3 }
 0x1aa   : > { %v1477_v12 = vpack.c.bf16 %v1383_v6, %v1381_v5 }
 0x1ab   : > { %v1478_v50 = vpack.c.bf16 %v1384_v10, %v1382_v9 }
 0x1ac   : > { %1613 = vmatmul.bf16.vlgmr.msrb.gmra.mxu2 %v1477_v12 }
 0x1ad   : > { %1702 = vmatmul.bf16.vlgmr.msrb.gmra.mxu3 %v1478_v50  ;;  %v1217_v14 = vpop.f32.mrf.mxu0 }
 0x1ae   : > { %v1306_v32 = vpop.f32.mrf.mxu1  ;;  %v1218_v24 = vadd.f32 %v1217_v14, %v3022_v54 }
 0x1af   : > { %v948_v15 = vpop.f32.mrf.mxu2  ;;  %v1307_v28 = vadd.f32 %v1306_v32, %v3026_v55 }
 0x1b0   : > { %v1037_v23 = vpop.f32.mrf.mxu3  ;;  %2247 = vmatmul.msk.bf16.gmra.mxu0 %vm448_vm0, %v2812_v4  ;;  %v1385_v36 = vmax.f32 %v1218_v24, 0.0 }
 0x1b1   : > { %v3040_v22 = vadd.f32 %v1037_v23, %v948_v15  ;;  %2263 = vmatmul.msk.bf16.gmra.mxu1 %vm448_vm0, %v2812_v4  ;;  %v1386_v18 = vmax.f32 %v1307_v28, 0.0 }
 0x1b5   : > { %v1219_v30 = vpop.f32.mrf.mxu0 }
 0x1b6   : > { %v1220_v20 = vadd.f32 %v1219_v30, %v3022_v54  ;;  %v1308_v31 = vpop.f32.mrf.mxu1 }
 0x1b7   : > { %v1309_v34 = vadd.f32 %v1308_v31, %v3026_v55  ;;  %v950_v35 = vpop.f32.mrf.mxu2 }
 0x1b8   : > { %v1387_v37 = vmax.f32 %v1220_v20, 0.0  ;;  %v1039_v39 = vpop.f32.mrf.mxu3 }
 0x1b9   : > { %v1388_v40 = vmax.f32 %v1309_v34, 0.0  ;;  %v3048_v42 = vadd.f32 %v1039_v39, %v950_v35 }
 0x1ba   : > { %v1479_v45 = vpack.c.bf16 %v1387_v37, %v1385_v36 }
 0x1bb   : > { %v1480_v4 = vpack.c.bf16 %v1388_v40, %v1386_v18 }
 0x1bc   : > { %1618 = vmatmul.bf16.gmra.mxu2 %v1479_v45 }
 0x1bd   : > { %1707 = vmatmul.bf16.gmra.mxu3 %v1480_v4  ;;  %v1222_v47 = vpop.f32.mrf.mxu0 }
 0x1be   : > { %v1311_v48 = vpop.f32.mrf.mxu1  ;;  %v1223_v53 = vadd.f32 %v1222_v47, %v3022_v54 }
 0x1bf   : > { %v953_v49 = vpop.f32.mrf.mxu2  ;;  %v1312_v58 = vadd.f32 %v1311_v48, %v3026_v55 }
 0x1c0   : > { %v1042_v52 = vpop.f32.mrf.mxu3  ;;  %2248 = vmatmul.msk.bf16.gmra.mxu0 %vm448_vm0, %v2829_v27  ;;  %v1389_v3 = vmax.f32 %v1223_v53, 0.0 }
 0x1c1   : > { %v3052_v25 = vadd.f32 %v1042_v52, %v953_v49  ;;  %2264 = vmatmul.msk.bf16.gmra.mxu1 %vm448_vm0, %v2829_v27  ;;  %v1390_v7 = vmax.f32 %v1312_v58, 0.0 }
 0x1c5   : > { %v1224_v21 = vpop.f32.mrf.mxu0 }
 0x1c6   : > { %v1225_v60 = vadd.f32 %v1224_v21, %v3022_v54  ;;  %v1313_v62 = vpop.f32.mrf.mxu1 }
 0x1c7   : > { %v1314_v63 = vadd.f32 %v1313_v62, %v3026_v55  ;;  %v955_v19 = vpop.f32.mrf.mxu2 }
 0x1c8   : > { %v1391_v5 = vmax.f32 %v1225_v60, 0.0  ;;  %v1044_v6 = vpop.f32.mrf.mxu3 }
 0x1c9   : > { %v1392_v9 = vmax.f32 %v1314_v63, 0.0  ;;  %v3060_v10 = vadd.f32 %v1044_v6, %v955_v19 }
 0x1ca   : > { %v1481_v12 = vpack.c.bf16 %v1391_v5, %v1389_v3 }
 0x1cb   : > { %v1482_v27 = vpack.c.bf16 %v1392_v9, %v1390_v7 }
 0x1cc   : > { %1623 = vmatmul.bf16.gmra.mxu2 %v1481_v12 }
 0x1cd   : > { %1712 = vmatmul.bf16.gmra.mxu3 %v1482_v27  ;;  %v1227_v50 = vpop.f32.mrf.mxu0 }
 0x1ce   : > { %v1316_v14 = vpop.f32.mrf.mxu1  ;;  %v1228_v24 = vadd.f32 %v1227_v50, %v3022_v54 }
 0x1cf   : > { %v958_v32 = vpop.f32.mrf.mxu2  ;;  %v1317_v28 = vadd.f32 %v1316_v14, %v3026_v55 }
 0x1d0   : > { %v1047_v15 = vpop.f32.mrf.mxu3  ;;  %2249 = vmatmul.msk.bf16.gmra.mxu0 %vm448_vm0, %v2840_v43  ;;  %v1393_v36 = vmax.f32 %v1228_v24, 0.0 }
 0x1d1   : > { %v3064_v23 = vadd.f32 %v1047_v15, %v958_v32  ;;  %2265 = vmatmul.msk.bf16.gmra.mxu1 %vm448_vm0, %v2840_v43  ;;  %v1394_v18 = vmax.f32 %v1317_v28, 0.0 }
 0x1d5   : > { %v1229_v30 = vpop.f32.mrf.mxu0 }
 0x1d6   : > { %v1230_v20 = vadd.f32 %v1229_v30, %v3022_v54  ;;  %v1318_v31 = vpop.f32.mrf.mxu1 }
 0x1d7   : > { %v1319_v34 = vadd.f32 %v1318_v31, %v3026_v55  ;;  %v960_v35 = vpop.f32.mrf.mxu2 }
 0x1d8   : > { %v1395_v37 = vmax.f32 %v1230_v20, 0.0  ;;  %v1049_v39 = vpop.f32.mrf.mxu3 }
 0x1d9   : > { %v1396_v40 = vmax.f32 %v1319_v34, 0.0  ;;  %v3072_v45 = vadd.f32 %v1049_v39, %v960_v35 }
 0x1da   : > { %v1483_v4 = vpack.c.bf16 %v1395_v37, %v1393_v36 }
 0x1db   : > { %v1484_v43 = vpack.c.bf16 %v1396_v40, %v1394_v18 }
 0x1dc   : > { %1628 = vmatmul.bf16.gmra.mxu2 %v1483_v4 }
 0x1dd   : > { %1717 = vmatmul.bf16.gmra.mxu3 %v1484_v43  ;;  %v1232_v47 = vpop.f32.mrf.mxu0 }
 0x1de   : > { %v1321_v48 = vpop.f32.mrf.mxu1  ;;  %v1233_v58 = vadd.f32 %v1232_v47, %v3022_v54 }
 0x1df   : > { %v963_v49 = vpop.f32.mrf.mxu2  ;;  %v1322_v21 = vadd.f32 %v1321_v48, %v3026_v55 }
 0x1e0   : > { %v1052_v52 = vpop.f32.mrf.mxu3  ;;  %2250 = vmatmul.msk.bf16.gmra.mxu0 %vm448_vm0, %v2857_v0  ;;  %v1397_v5 = vmax.f32 %v1233_v58, 0.0 }
 0x1e1   : > { %v3076_v53 = vadd.f32 %v1052_v52, %v963_v49  ;;  %2266 = vmatmul.msk.bf16.gmra.mxu1 %vm448_vm0, %v2857_v0  ;;  %v1398_v9 = vmax.f32 %v1322_v21, 0.0 }
 0x1e5   : > { %v1234_v60 = vpop.f32.mrf.mxu0 }
 0x1e6   : > { %v1235_v62 = vadd.f32 %v1234_v60, %v3022_v54  ;;  %v1323_v63 = vpop.f32.mrf.mxu1 }
 0x1e7   : > { %v1324_v19 = vadd.f32 %v1323_v63, %v3026_v55  ;;  %v965_v3 = vpop.f32.mrf.mxu2 }
 0x1e8   : > { %v1399_v6 = vmax.f32 %v1235_v62, 0.0  ;;  %v1054_v7 = vpop.f32.mrf.mxu3 }
 0x1e9   : > { %v1400_v12 = vmax.f32 %v1324_v19, 0.0  ;;  %v3084_v27 = vadd.f32 %v1054_v7, %v965_v3 }
 0x1ea   : > { %v1485_v50 = vpack.c.bf16 %v1399_v6, %v1397_v5 }
 0x1eb   : > { %v1486_v0 = vpack.c.bf16 %v1400_v12, %v1398_v9 }
 0x1ec   : > { %1633 = vmatmul.bf16.gmra.mxu2 %v1485_v50 }
 0x1ed   : > { %1722 = vmatmul.bf16.gmra.mxu3 %v1486_v0  ;;  %v1237_v14 = vpop.f32.mrf.mxu0 }
 0x1ee   : > { %v1326_v32 = vpop.f32.mrf.mxu1  ;;  %v1238_v30 = vadd.f32 %v1237_v14, %v3022_v54 }
 0x1ef   : > { %v968_v15 = vpop.f32.mrf.mxu2  ;;  %v1327_v20 = vadd.f32 %v1326_v32, %v3026_v55 }
 0x1f0   : > { %v1057_v24 = vpop.f32.mrf.mxu3  ;;  %2251 = vmatmul.msk.bf16.gmra.mxu0 %vm448_vm0, %v2868_v16  ;;  %v1401_v39 = vmax.f32 %v1238_v30, 0.0 }
 0x1f1   : > { %v3088_v28 = vadd.f32 %v1057_v24, %v968_v15  ;;  %2267 = vmatmul.msk.bf16.gmra.mxu1 %vm448_vm0, %v2868_v16  ;;  %v1402_v4 = vmax.f32 %v1327_v20, 0.0 }
 0x1f5   : > { %v1239_v31 = vpop.f32.mrf.mxu0 }
 0x1f6   : > { %v1240_v34 = vadd.f32 %v1239_v31, %v3022_v54  ;;  %v1328_v35 = vpop.f32.mrf.mxu1 }
 0x1f7   : > { %v1329_v36 = vadd.f32 %v1328_v35, %v3026_v55  ;;  %v970_v37 = vpop.f32.mrf.mxu2 }
 0x1f8   : > { %v1403_v18 = vmax.f32 %v1240_v34, 0.0  ;;  %v1059_v40 = vpop.f32.mrf.mxu3 }
 0x1f9   : > { %v1404_v43 = vmax.f32 %v1329_v36, 0.0  ;;  %v3096_v47 = vadd.f32 %v1059_v40, %v970_v37 }
 0x1fa   : > { %v1487_v48 = vpack.c.bf16 %v1403_v18, %v1401_v39 }
 0x1fb   : > { %v1488_v16 = vpack.c.bf16 %v1404_v43, %v1402_v4 }
 0x1fc   : > { %1638 = vmatmul.bf16.gmra.mxu2 %v1487_v48 }
 0x1fd   : > { %1727 = vmatmul.bf16.gmra.mxu3 %v1488_v16  ;;  %v1242_v49 = vpop.f32.mrf.mxu0 }
 0x1fe   : > { %v1331_v52 = vpop.f32.mrf.mxu1  ;;  %v1243_v62 = vadd.f32 %v1242_v49, %v3022_v54 }
 0x1ff   : > { %v973_v58 = vpop.f32.mrf.mxu2  ;;  %v1332_v63 = vadd.f32 %v1331_v52, %v3026_v55 }
 0x200   : > { %v1062_v21 = vpop.f32.mrf.mxu3  ;;  %2252 = vmatmul.msk.bf16.gmra.mxu0 %vm448_vm0, %v2885_v41  ;;  %v1405_v9 = vmax.f32 %v1243_v62, 0.0 }
 0x201   : > { %v3100_v60 = vadd.f32 %v1062_v21, %v973_v58  ;;  %2268 = vmatmul.msk.bf16.gmra.mxu1 %vm448_vm0, %v2885_v41  ;;  %v1406_v0 = vmax.f32 %v1332_v63, 0.0 }
 0x205   : > { %v1244_v19 = vpop.f32.mrf.mxu0 }
 0x206   : > { %v1245_v3 = vadd.f32 %v1244_v19, %v3022_v54  ;;  %v1333_v5 = vpop.f32.mrf.mxu1 }
 0x207   : > { %v1334_v6 = vadd.f32 %v1333_v5, %v3026_v55  ;;  %v975_v7 = vpop.f32.mrf.mxu2 }
 0x208   : > { %v1407_v12 = vmax.f32 %v1245_v3, 0.0  ;;  %v1064_v50 = vpop.f32.mrf.mxu3 }
 0x209   : > { %v1408_v14 = vmax.f32 %v1334_v6, 0.0  ;;  %v3108_v32 = vadd.f32 %v1064_v50, %v975_v7 }
 0x20a   : > { %v1489_v15 = vpack.c.bf16 %v1407_v12, %v1405_v9 }
 0x20b   : > { %v1490_v41 = vpack.c.bf16 %v1408_v14, %v1406_v0 }
 0x20c   : > { %1643 = vmatmul.bf16.gmra.mxu2 %v1489_v15 }
 0x20d   : > { %1732 = vmatmul.bf16.gmra.mxu3 %v1490_v41  ;;  %v1247_v24 = vpop.f32.mrf.mxu0 }
 0x20e   : > { %v1336_v30 = vpop.f32.mrf.mxu1  ;;  %v1248_v35 = vadd.f32 %v1247_v24, %v3022_v54 }
 0x20f   : > { %v978_v20 = vpop.f32.mrf.mxu2  ;;  %v1337_v36 = vadd.f32 %v1336_v30, %v3026_v55 }
 0x210   : > { %v1067_v31 = vpop.f32.mrf.mxu3  ;;  %2253 = vmatmul.msk.bf16.gmra.mxu0 %vm448_vm0, %v2896_v61  ;;  %v1409_v43 = vmax.f32 %v1248_v35, 0.0 }
 0x211   : > { %v3112_v34 = vadd.f32 %v1067_v31, %v978_v20  ;;  %2269 = vmatmul.msk.bf16.gmra.mxu1 %vm448_vm0, %v2896_v61  ;;  %v1410_v49 = vmax.f32 %v1337_v36, 0.0 }
 0x215   : > { %v1249_v37 = vpop.f32.mrf.mxu0 }
 0x216   : > { %v1250_v39 = vadd.f32 %v1249_v37, %v3022_v54  ;;  %v1338_v18 = vpop.f32.mrf.mxu1 }
 0x217   : > { %v1339_v40 = vadd.f32 %v1338_v18, %v3026_v55  ;;  %v980_v4 = vpop.f32.mrf.mxu2 }
 0x218   : > { %v1411_v48 = vmax.f32 %v1250_v39, 0.0  ;;  %v1069_v16 = vpop.f32.mrf.mxu3 }
 0x219   : > { %v1412_v52 = vmax.f32 %v1339_v40, 0.0  ;;  %v3120_v58 = vadd.f32 %v1069_v16, %v980_v4 }
 0x21a   : > { %v1491_v21 = vpack.c.bf16 %v1411_v48, %v1409_v43  ;;  %v3136_v43 = vld [vmem:[%s3302_s4] ss:$0 sm:$0xff] }
 0x21b   : > { %v1492_v61 = vpack.c.bf16 %v1412_v52, %v1410_v49 }
 0x21c   : > { %1648 = vmatmul.bf16.gmra.mxu2 %v1491_v21 }
 0x21d   : > { %1737 = vmatmul.bf16.gmra.mxu3 %v1492_v61  ;;  %v1252_v62 = vpop.f32.mrf.mxu0 }
 0x21e   : > { %v1341_v63 = vpop.f32.mrf.mxu1  ;;  %v1253_v6 = vadd.f32 %v1252_v62, %v3022_v54 }
 0x21f   : > { %v983_v19 = vpop.f32.mrf.mxu2  ;;  %v1342_v7 = vadd.f32 %v1341_v63, %v3026_v55 }
 0x220   : > { %v1072_v3 = vpop.f32.mrf.mxu3  ;;  %v1413_v15 = vmax.f32 %v1253_v6, 0.0 }
 0x221   : > { %v3122_v5 = vadd.f32 %v1072_v3, %v983_v19  ;;  %v1414_v30 = vmax.f32 %v1342_v7, 0.0 }
 0x225   : > { %v1254_v9 = vpop.f32.mrf.mxu0 }
 0x226   : > { %v1255_v12 = vadd.f32 %v1254_v9, %v3022_v54  ;;  %v1343_v50 = vpop.f32.mrf.mxu1 }
 0x227   : > { %v1344_v0 = vadd.f32 %v1343_v50, %v3026_v55  ;;  %v985_v14 = vpop.f32.mrf.mxu2 }
 0x228   : > { %v1415_v41 = vmax.f32 %v1255_v12, 0.0  ;;  %v1074_v24 = vpop.f32.mrf.mxu3 }
 0x229   : > { %v1416_v20 = vmax.f32 %v1344_v0, 0.0  ;;  %v3128_v31 = vadd.f32 %v1074_v24, %v985_v14 }
 0x22a   : > { %v1493_v35 = vpack.c.bf16 %v1415_v41, %v1413_v15 }
 0x22b   : > { %v1494_v36 = vpack.c.bf16 %v1416_v20, %v1414_v30 }
 0x22c   : > { %1653 = vmatmul.bf16.gmra.mxu2 %v1493_v35 }
 0x22d   : > { %1742 = vmatmul.bf16.gmra.mxu3 %v1494_v36  ;;  %v1257_v37 = vpop.f32.mrf.mxu0 }
 0x22e   : > { %v1346_v39 = vpop.f32.mrf.mxu1  ;;  %v1258_v16 = vadd.f32 %v1257_v37, %v3022_v54 }
 0x22f   : > { %v1614_v18 = vpop.f32.mrf.mxu2  ;;  %v1347_v49 = vadd.f32 %v1346_v39, %v3026_v55 }
 0x230   : > { %v1703_v40 = vpop.f32.mrf.mxu3  ;;  %v1417_v3 = vmax.f32 %v1258_v16, 0.0 }
 0x231   : > { %v1704_v4 = vadd.f32 %v1703_v40, %v1614_v18  ;;  %v1418_v7 = vmax.f32 %v1347_v49, 0.0 }
 0x233   : > { %v1783_v48 = vadd.f32 %v1704_v4, %v2928_v46 }
 0x235   : > { %v1883_v52 = vadd.f32 %v3136_v43, %v1783_v48  ;;  %v1259_v21 = vpop.f32.mrf.mxu0 }
 0x236   : > { %v1260_v61 = vadd.f32 %v1259_v21, %v3022_v54  ;;  %v1348_v62 = vpop.f32.mrf.mxu1 }
 0x237   : > { %1915 = vst [vmem:[%s3143_s15] sm:$0xff] %v1883_v52  ;;  %v1349_v63 = vadd.f32 %v1348_v62, %v3026_v55  ;;  %v1616_v19 = vpop.f32.mrf.mxu2 }
 0x238   : > { %v1419_v46 = vmax.f32 %v1260_v61, 0.0  ;;  %v1705_v6 = vpop.f32.mrf.mxu3 }
 0x239   : > { %v1420_v9 = vmax.f32 %v1349_v63, 0.0  ;;  %v1706_v12 = vadd.f32 %v1705_v6, %v1616_v19 }
 0x23a   : > { %v1495_v50 = vpack.c.bf16 %v1419_v46, %v1417_v3 }
 0x23b   : > { %v1496_v0 = vpack.c.bf16 %v1420_v9, %v1418_v7  ;;  %v1784_v14 = vadd.f32 %v1706_v12, %v2936_v1 }
 0x23c   : > { %1658 = vmatmul.bf16.gmra.mxu2 %v1495_v50 }
 0x23d   : > { %v1884_v15 = vadd.f32 %v3136_v43, %v1784_v14  ;;  %1747 = vmatmul.bf16.gmra.mxu3 %v1496_v0  ;;  %v1262_v41 = vpop.f32.mrf.mxu0 }
 0x23e   : > { %v1351_v24 = vpop.f32.mrf.mxu1  ;;  %v1263_v37 = vadd.f32 %v1262_v41, %v3022_v54 }
 0x23f   : > { %1916 = vst [vmem:[%s3143_s15 + $0x8] sm:$0xff] %v1884_v15  ;;  %v1619_v30 = vpop.f32.mrf.mxu2  ;;  %v1352_v39 = vadd.f32 %v1351_v24, %v3026_v55 }
 0x240   : > { %v1708_v20 = vpop.f32.mrf.mxu3  ;;  %v1421_v49 = vmax.f32 %v1263_v37, 0.0 }
 0x241   : > { %v1709_v35 = vadd.f32 %v1708_v20, %v1619_v30  ;;  %v1422_v61 = vmax.f32 %v1352_v39, 0.0 }
 0x243   : > { %v1785_v36 = vadd.f32 %v1709_v35, %v2940_v8 }
 0x245   : > { %v1885_v18 = vadd.f32 %v3136_v43, %v1785_v36  ;;  %v1264_v1 = vpop.f32.mrf.mxu0 }
 0x246   : > { %v1265_v40 = vadd.f32 %v1264_v1, %v3022_v54  ;;  %v1353_v4 = vpop.f32.mrf.mxu1 }
 0x247   : > { %1917 = vst [vmem:[%s3143_s15 + $0x10] sm:$0xff] %v1885_v18  ;;  %v1354_v48 = vadd.f32 %v1353_v4, %v3026_v55  ;;  %v1621_v16 = vpop.f32.mrf.mxu2 }
 0x248   : > { %v1423_v52 = vmax.f32 %v1265_v40, 0.0  ;;  %v1710_v21 = vpop.f32.mrf.mxu3 }
 0x249   : > { %v1424_v8 = vmax.f32 %v1354_v48, 0.0  ;;  %v1711_v62 = vadd.f32 %v1710_v21, %v1621_v16 }
 0x24a   : > { %v1497_v63 = vpack.c.bf16 %v1423_v52, %v1421_v49 }
 0x24b   : > { %v1498_v19 = vpack.c.bf16 %v1424_v8, %v1422_v61  ;;  %v1786_v3 = vadd.f32 %v1711_v62, %v2948_v29 }
 0x24c   : > { %1663 = vmatmul.bf16.gmra.mxu2 %v1497_v63 }
 0x24d   : > { %v1886_v46 = vadd.f32 %v3136_v43, %v1786_v3  ;;  %1752 = vmatmul.bf16.gmra.mxu3 %v1498_v19  ;;  %v1267_v6 = vpop.f32.mrf.mxu0 }
 0x24e   : > { %v1356_v7 = vpop.f32.mrf.mxu1  ;;  %v1268_v14 = vadd.f32 %v1267_v6, %v3022_v54 }
 0x24f   : > { %1918 = vst [vmem:[%s3143_s15 + $0x18] sm:$0xff] %v1886_v46  ;;  %v1624_v9 = vpop.f32.mrf.mxu2  ;;  %v1357_v15 = vadd.f32 %v1356_v7, %v3026_v55 }
 0x250   : > { %v1713_v12 = vpop.f32.mrf.mxu3  ;;  %v1425_v36 = vmax.f32 %v1268_v14, 0.0 }
 0x251   : > { %v1714_v50 = vadd.f32 %v1713_v12, %v1624_v9  ;;  %v1426_v18 = vmax.f32 %v1357_v15, 0.0 }
 0x253   : > { %v1787_v0 = vadd.f32 %v1714_v50, %v2958_v38 }
 0x255   : > { %v1887_v41 = vadd.f32 %v3136_v43, %v1787_v0  ;;  %v1269_v29 = vpop.f32.mrf.mxu0 }
 0x256   : > { %v1270_v24 = vadd.f32 %v1269_v29, %v3022_v54  ;;  %v1358_v30 = vpop.f32.mrf.mxu1 }
 0x257   : > { %1919 = vst [vmem:[%s3143_s15 + $0x20] sm:$0xff] %v1887_v41  ;;  %v1359_v20 = vadd.f32 %v1358_v30, %v3026_v55  ;;  %v1626_v35 = vpop.f32.mrf.mxu2 }
 0x258   : > { %v1427_v37 = vmax.f32 %v1270_v24, 0.0  ;;  %v1715_v39 = vpop.f32.mrf.mxu3 }
 0x259   : > { %v1428_v38 = vmax.f32 %v1359_v20, 0.0  ;;  %v1716_v1 = vadd.f32 %v1715_v39, %v1626_v35 }
 0x25a   : > { %v1499_v40 = vpack.c.bf16 %v1427_v37, %v1425_v36 }
 0x25b   : > { %v1500_v4 = vpack.c.bf16 %v1428_v38, %v1426_v18  ;;  %v1788_v48 = vadd.f32 %v1716_v1, %v2966_v57 }
 0x25c   : > { %1668 = vmatmul.bf16.gmra.mxu2 %v1499_v40 }
 0x25d   : > { %v1888_v16 = vadd.f32 %v3136_v43, %v1788_v48  ;;  %1757 = vmatmul.bf16.gmra.mxu3 %v1500_v4  ;;  %v1272_v49 = vpop.f32.mrf.mxu0 }
 0x25e   : > { %v1361_v52 = vpop.f32.mrf.mxu1  ;;  %v1273_v63 = vadd.f32 %v1272_v49, %v3022_v54 }
 0x25f   : > { %1920 = vst [vmem:[%s3143_s15 + $0x28] sm:$0xff] %v1888_v16  ;;  %v1629_v21 = vpop.f32.mrf.mxu2  ;;  %v1362_v19 = vadd.f32 %v1361_v52, %v3026_v55 }
 0x260   : > { %v1718_v61 = vpop.f32.mrf.mxu3  ;;  %v1429_v12 = vmax.f32 %v1273_v63, 0.0 }
 0x261   : > { %v1719_v8 = vadd.f32 %v1718_v61, %v1629_v21  ;;  %v1430_v14 = vmax.f32 %v1362_v19, 0.0 }
 0x263   : > { %v1789_v62 = vadd.f32 %v1719_v8, %v2970_v2 }
 0x265   : > { %v1889_v3 = vadd.f32 %v3136_v43, %v1789_v62  ;;  %v1274_v57 = vpop.f32.mrf.mxu0 }
 0x266   : > { %v1275_v46 = vadd.f32 %v1274_v57, %v3022_v54  ;;  %v1363_v6 = vpop.f32.mrf.mxu1 }
 0x267   : > { %1921 = vst [vmem:[%s3143_s15 + $0x30] sm:$0xff] %v1889_v3  ;;  %v1364_v7 = vadd.f32 %v1363_v6, %v3026_v55  ;;  %v1631_v9 = vpop.f32.mrf.mxu2 }
 0x268   : > { %v1431_v50 = vmax.f32 %v1275_v46, 0.0  ;;  %v1720_v0 = vpop.f32.mrf.mxu3 }
 0x269   : > { %v1432_v2 = vmax.f32 %v1364_v7, 0.0  ;;  %v1721_v15 = vadd.f32 %v1720_v0, %v1631_v9 }
 0x26a   : > { %v1501_v41 = vpack.c.bf16 %v1431_v50, %v1429_v12 }
 0x26b   : > { %v1502_v29 = vpack.c.bf16 %v1432_v2, %v1430_v14  ;;  %v1790_v24 = vadd.f32 %v1721_v15, %v2978_v17 }
 0x26c   : > { %1673 = vmatmul.bf16.gmra.mxu2 %v1501_v41 }
 0x26d   : > { %v1890_v30 = vadd.f32 %v3136_v43, %v1790_v24  ;;  %1762 = vmatmul.bf16.gmra.mxu3 %v1502_v29  ;;  %v1277_v20 = vpop.f32.mrf.mxu0 }
 0x26e   : > { %v1366_v35 = vpop.f32.mrf.mxu1  ;;  %v1278_v38 = vadd.f32 %v1277_v20, %v3022_v54 }
 0x26f   : > { %1922 = vst [vmem:[%s3143_s15 + $0x38] sm:$0xff] %v1890_v30  ;;  %v1634_v36 = vpop.f32.mrf.mxu2  ;;  %v1367_v1 = vadd.f32 %v1366_v35, %v3026_v55 }
 0x270   : > { %v1723_v37 = vpop.f32.mrf.mxu3  ;;  %v1433_v52 = vmax.f32 %v1278_v38, 0.0 }
 0x271   : > { %v1724_v39 = vadd.f32 %v1723_v37, %v1634_v36  ;;  %v1434_v8 = vmax.f32 %v1367_v1, 0.0 }
 0x273   : > { %v1791_v18 = vadd.f32 %v1724_v39, %v2988_v33 }
 0x275   : > { %v1891_v40 = vadd.f32 %v3136_v43, %v1791_v18  ;;  %v1279_v17 = vpop.f32.mrf.mxu0 }
 0x276   : > { %v1280_v4 = vadd.f32 %v1279_v17, %v3022_v54  ;;  %v1368_v48 = vpop.f32.mrf.mxu1 }
 0x277   : > { %1923 = vst [vmem:[%s3143_s15 + $0x40] sm:$0xff] %v1891_v40  ;;  %v1369_v16 = vadd.f32 %v1368_v48, %v3026_v55  ;;  %v1636_v49 = vpop.f32.mrf.mxu2 }
 0x278   : > { %v1435_v21 = vmax.f32 %v1280_v4, 0.0  ;;  %v1725_v61 = vpop.f32.mrf.mxu3 }
 0x279   : > { %v1436_v33 = vmax.f32 %v1369_v16, 0.0  ;;  %v1726_v62 = vadd.f32 %v1725_v61, %v1636_v49 }
 0x27a   : > { %v1503_v63 = vpack.c.bf16 %v1435_v21, %v1433_v52 }
 0x27b   : > { %v1504_v19 = vpack.c.bf16 %v1436_v33, %v1434_v8  ;;  %v1792_v3 = vadd.f32 %v1726_v62, %v2996_v51 }
 0x27c   : > { %1678 = vmatmul.bf16.gmra.mxu2 %v1503_v63 }
 0x27d   : > { %v1892_v57 = vadd.f32 %v3136_v43, %v1792_v3  ;;  %1767 = vmatmul.bf16.gmra.mxu3 %v1504_v19  ;;  %v1282_v46 = vpop.f32.mrf.mxu0 }
 0x27e   : > { %v1371_v6 = vpop.f32.mrf.mxu1  ;;  %v1283_v0 = vadd.f32 %v1282_v46, %v3022_v54 }
 0x27f   : > { %1924 = vst [vmem:[%s3143_s15 + $0x48] sm:$0xff] %v1892_v57  ;;  %v1639_v7 = vpop.f32.mrf.mxu2  ;;  %v1372_v14 = vadd.f32 %v1371_v6, %v3026_v55 }
 0x280   : > { %v1728_v9 = vpop.f32.mrf.mxu3  ;;  %v1437_v30 = vmax.f32 %v1283_v0, 0.0 }
 0x281   : > { %v1729_v12 = vadd.f32 %v1728_v9, %v1639_v7  ;;  %v1438_v36 = vmax.f32 %v1372_v14, 0.0 }
 0x283   : > { %v1793_v50 = vadd.f32 %v1729_v12, %v3000_v59 }
 0x285   : > { %v1893_v2 = vadd.f32 %v3136_v43, %v1793_v50  ;;  %v1284_v51 = vpop.f32.mrf.mxu0 }
 0x286   : > { %v1285_v15 = vadd.f32 %v1284_v51, %v3022_v54  ;;  %v1373_v41 = vpop.f32.mrf.mxu1 }
 0x287   : > { %1925 = vst [vmem:[%s3143_s15 + $0x50] sm:$0xff] %v1893_v2  ;;  %v1374_v29 = vadd.f32 %v1373_v41, %v3026_v55  ;;  %v1641_v24 = vpop.f32.mrf.mxu2 }
 0x288   : > { %v1439_v20 = vmax.f32 %v1285_v15, 0.0  ;;  %v1730_v35 = vpop.f32.mrf.mxu3 }
 0x289   : > { %v1440_v59 = vmax.f32 %v1374_v29, 0.0  ;;  %v1731_v37 = vadd.f32 %v1730_v35, %v1641_v24 }
 0x28a   : > { %v1505_v39 = vpack.c.bf16 %v1439_v20, %v1437_v30 }
 0x28b   : > { %v1506_v18 = vpack.c.bf16 %v1440_v59, %v1438_v36  ;;  %v1794_v38 = vadd.f32 %v1731_v37, %v3008_v13 }
 0x28c   : > { %1683 = vmatmul.bf16.gmra.mxu2 %v1505_v39 }
 0x28d   : > { %v1894_v1 = vadd.f32 %v3136_v43, %v1794_v38  ;;  %1772 = vmatmul.bf16.gmra.mxu3 %v1506_v18  ;;  %v1287_v40 = vpop.f32.mrf.mxu0 }
 0x28e   : > { %v1376_v17 = vpop.f32.mrf.mxu1  ;;  %v1288_v52 = vadd.f32 %v1287_v40, %v3022_v54 }
 0x28f   : > { %1926 = vst [vmem:[%s3143_s15 + $0x58] sm:$0xff] %v1894_v1  ;;  %v1644_v4 = vpop.f32.mrf.mxu2  ;;  %v1377_v21 = vadd.f32 %v1376_v17, %v3026_v55 }
 0x290   : > { %v1733_v48 = vpop.f32.mrf.mxu3  ;;  %v1441_v19 = vmax.f32 %v1288_v52, 0.0 }
 0x291   : > { %v1734_v16 = vadd.f32 %v1733_v48, %v1644_v4 }
 0x293   : > { %v1795_v49 = vadd.f32 %v1734_v16, %v3012_v26  ;;  %v1442_v26 = vmax.f32 %v1377_v21, 0.0 }
 0x295   : > { %v1895_v61 = vadd.f32 %v3136_v43, %v1795_v49  ;;  %v1289_v13 = vpop.f32.mrf.mxu0 }
 0x296   : > { %v1290_v8 = vadd.f32 %v1289_v13, %v3022_v54  ;;  %v1378_v33 = vpop.f32.mrf.mxu1 }
 0x297   : > { %1927 = vst [vmem:[%s3143_s15 + $0x60] sm:$0xff] %v1895_v61  ;;  %v1379_v62 = vadd.f32 %v1378_v33, %v3026_v55  ;;  %v1646_v63 = vpop.f32.mrf.mxu2 }
 0x298   : > { %v1443_v3 = vmax.f32 %v1290_v8, 0.0  ;;  %v1735_v57 = vpop.f32.mrf.mxu3 }
 0x299   : > { %v1444_v46 = vmax.f32 %v1379_v62, 0.0  ;;  %v1736_v6 = vadd.f32 %v1735_v57, %v1646_v63 }
 0x29a   : > { %v1507_v7 = vpack.c.bf16 %v1443_v3, %v1441_v19 }
 0x29b   : > { %v1508_v9 = vpack.c.bf16 %v1444_v46, %v1442_v26  ;;  %v1796_v12 = vadd.f32 %v1736_v6, %v3020_v44 }
 0x29c   : > { %1688 = vmatmul.bf16.gmra.mxu2 %v1507_v7 }
 0x29d   : > { %v1896_v54 = vadd.f32 %v3136_v43, %v1796_v12  ;;  %1777 = vmatmul.bf16.gmra.mxu3 %v1508_v9 }
 0x29f   : > { %1928 = vst [vmem:[%s3143_s15 + $0x68] sm:$0xff] %v1896_v54  ;;  %v1649_v50 = vpop.f32.mrf.mxu2 }
 0x2a0   : > { %v1738_v55 = vpop.f32.mrf.mxu3 }
 0x2a1   : > { %v1739_v0 = vadd.f32 %v1738_v55, %v1649_v50 }
 0x2a3   : > { %v1797_v14 = vadd.f32 %v1739_v0, %v3028_v56 }
 0x2a5   : > { %v1897_v2 = vadd.f32 %v3136_v43, %v1797_v14 }
 0x2a7   : > { %1929 = vst [vmem:[%s3143_s15 + $0x70] sm:$0xff] %v1897_v2  ;;  %v1651_v51 = vpop.f32.mrf.mxu2 }
 0x2a8   : > { %v1740_v15 = vpop.f32.mrf.mxu3 }
 0x2a9   : > { %v1741_v41 = vadd.f32 %v1740_v15, %v1651_v51 }
 0x2ab   : > { %v1798_v44 = vadd.f32 %v1741_v41, %v3036_v11 }
 0x2ad   : > { %v1898_v29 = vadd.f32 %v3136_v43, %v1798_v44 }
 0x2af   : > { %1930 = vst [vmem:[%s3143_s15 + $0x78] sm:$0xff] %v1898_v29  ;;  %v1654_v24 = vpop.f32.mrf.mxu2 }
 0x2b0   : > { %v1743_v30 = vpop.f32.mrf.mxu3 }
 0x2b1   : > { %v1744_v20 = vadd.f32 %v1743_v30, %v1654_v24 }
 0x2b3   : > { %v1799_v35 = vadd.f32 %v1744_v20, %v3040_v22 }
 0x2b5   : > { %v1899_v56 = vadd.f32 %v3136_v43, %v1799_v35 }
 0x2b7   : > { %1931 = vst [vmem:[%s3143_s15 + $0x80] sm:$0xff] %v1899_v56  ;;  %v1656_v36 = vpop.f32.mrf.mxu2 }
 0x2b8   : > { %v1745_v59 = vpop.f32.mrf.mxu3 }
 0x2b9   : > { %v1746_v37 = vadd.f32 %v1745_v59, %v1656_v36 }
 0x2bb   : > { %v1800_v39 = vadd.f32 %v1746_v37, %v3048_v42 }
 0x2bd   : > { %v1900_v11 = vadd.f32 %v3136_v43, %v1800_v39 }
 0x2bf   : > { %1932 = vst [vmem:[%s3143_s15 + $0x88] sm:$0xff] %v1900_v11  ;;  %v1659_v18 = vpop.f32.mrf.mxu2 }
 0x2c0   : > { %v1748_v38 = vpop.f32.mrf.mxu3 }
 0x2c1   : > { %v1749_v1 = vadd.f32 %v1748_v38, %v1659_v18 }
 0x2c3   : > { %v1801_v40 = vadd.f32 %v1749_v1, %v3052_v25 }
 0x2c5   : > { %v1901_v22 = vadd.f32 %v3136_v43, %v1801_v40 }
 0x2c7   : > { %1933 = vst [vmem:[%s3143_s15 + $0x90] sm:$0xff] %v1901_v22  ;;  %v1661_v17 = vpop.f32.mrf.mxu2 }
 0x2c8   : > { %v1750_v4 = vpop.f32.mrf.mxu3 }
 0x2c9   : > { %v1751_v48 = vadd.f32 %v1750_v4, %v1661_v17 }
 0x2cb   : > { %v1802_v16 = vadd.f32 %v1751_v48, %v3060_v10 }
 0x2cd   : > { %v1902_v42 = vadd.f32 %v3136_v43, %v1802_v16 }
 0x2cf   : > { %1934 = vst [vmem:[%s3143_s15 + $0x98] sm:$0xff] %v1902_v42  ;;  %v1664_v49 = vpop.f32.mrf.mxu2 }
 0x2d0   : > { %v1753_v52 = vpop.f32.mrf.mxu3 }
 0x2d1   : > { %v1754_v21 = vadd.f32 %v1753_v52, %v1664_v49 }
 0x2d3   : > { %v1803_v61 = vadd.f32 %v1754_v21, %v3064_v23 }
 0x2d5   : > { %v1903_v25 = vadd.f32 %v3136_v43, %v1803_v61 }
 0x2d7   : > { %1935 = vst [vmem:[%s3143_s15 + $0xa0] sm:$0xff] %v1903_v25  ;;  %v1666_v13 = vpop.f32.mrf.mxu2 }
 0x2d8   : > { %v1755_v8 = vpop.f32.mrf.mxu3 }
 0x2d9   : > { %v1756_v33 = vadd.f32 %v1755_v8, %v1666_v13 }
 0x2db   : > { %v1804_v62 = vadd.f32 %v1756_v33, %v3072_v45 }
 0x2dd   : > { %v1904_v10 = vadd.f32 %v3136_v43, %v1804_v62 }
 0x2df   : > { %1936 = vst [vmem:[%s3143_s15 + $0xa8] sm:$0xff] %v1904_v10  ;;  %v1669_v63 = vpop.f32.mrf.mxu2 }
 0x2e0   : > { %v1758_v19 = vpop.f32.mrf.mxu3 }
 0x2e1   : > { %v1759_v3 = vadd.f32 %v1758_v19, %v1669_v63 }
 0x2e3   : > { %v1805_v57 = vadd.f32 %v1759_v3, %v3076_v53 }
 0x2e5   : > { %v1905_v23 = vadd.f32 %v3136_v43, %v1805_v57 }
 0x2e7   : > { %1937 = vst [vmem:[%s3143_s15 + $0xb0] sm:$0xff] %v1905_v23  ;;  %v1671_v26 = vpop.f32.mrf.mxu2 }
 0x2e8   : > { %v1760_v46 = vpop.f32.mrf.mxu3 }
 0x2e9   : > { %v1761_v6 = vadd.f32 %v1760_v46, %v1671_v26 }
 0x2eb   : > { %v1806_v7 = vadd.f32 %v1761_v6, %v3084_v27 }
 0x2ed   : > { %v1906_v45 = vadd.f32 %v3136_v43, %v1806_v7 }
 0x2ef   : > { %1938 = vst [vmem:[%s3143_s15 + $0xb8] sm:$0xff] %v1906_v45  ;;  %v1674_v9 = vpop.f32.mrf.mxu2 }
 0x2f0   : > { %v1763_v12 = vpop.f32.mrf.mxu3 }
 0x2f1   : > { %v1764_v54 = vadd.f32 %v1763_v12, %v1674_v9 }
 0x2f3   : > { %v1807_v50 = vadd.f32 %v1764_v54, %v3088_v28 }
 0x2f5   : > { %v1907_v53 = vadd.f32 %v3136_v43, %v1807_v50 }
 0x2f7   : > { %1939 = vst [vmem:[%s3143_s15 + $0xc0] sm:$0xff] %v1907_v53  ;;  %v1676_v55 = vpop.f32.mrf.mxu2 }
 0x2f8   : > { %v1765_v0 = vpop.f32.mrf.mxu3 }
 0x2f9   : > { %v1766_v14 = vadd.f32 %v1765_v0, %v1676_v55 }
 0x2fb   : > { %v1808_v2 = vadd.f32 %v1766_v14, %v3096_v47 }
 0x2fd   : > { %v1908_v27 = vadd.f32 %v3136_v43, %v1808_v2 }
 0x2ff   : > { %1940 = vst [vmem:[%s3143_s15 + $0xc8] sm:$0xff] %v1908_v27  ;;  %v1679_v51 = vpop.f32.mrf.mxu2 }
 0x300   : > { %v1768_v15 = vpop.f32.mrf.mxu3 }
 0x301   : > { %v1769_v41 = vadd.f32 %v1768_v15, %v1679_v51 }
 0x303   : > { %v1809_v44 = vadd.f32 %v1769_v41, %v3100_v60 }
 0x305   : > { %v1909_v28 = vadd.f32 %v3136_v43, %v1809_v44 }
 0x307   : > { %1941 = vst [vmem:[%s3143_s15 + $0xd0] sm:$0xff] %v1909_v28  ;;  %v1681_v29 = vpop.f32.mrf.mxu2 }
 0x308   : > { %v1770_v24 = vpop.f32.mrf.mxu3 }
 0x309   : > { %v1771_v30 = vadd.f32 %v1770_v24, %v1681_v29 }
 0x30b   : > { %v1810_v20 = vadd.f32 %v1771_v30, %v3108_v32 }
 0x30d   : > { %v1910_v47 = vadd.f32 %v3136_v43, %v1810_v20 }
 0x30f   : > { %1942 = vst [vmem:[%s3143_s15 + $0xd8] sm:$0xff] %v1910_v47  ;;  %v1684_v35 = vpop.f32.mrf.mxu2 }
 0x310   : > { %v1773_v56 = vpop.f32.mrf.mxu3 }
 0x311   : > { %v1774_v36 = vadd.f32 %v1773_v56, %v1684_v35 }
 0x313   : > { %v1811_v59 = vadd.f32 %v1774_v36, %v3112_v34 }
 0x315   : > { %v1911_v60 = vadd.f32 %v3136_v43, %v1811_v59 }
 0x317   : > { %1943 = vst [vmem:[%s3143_s15 + $0xe0] sm:$0xff] %v1911_v60  ;;  %v1686_v37 = vpop.f32.mrf.mxu2 }
 0x318   : > { %v1775_v39 = vpop.f32.mrf.mxu3 }
 0x319   : > { %v1776_v11 = vadd.f32 %v1775_v39, %v1686_v37 }
 0x31b   : > { %v1812_v18 = vadd.f32 %v1776_v11, %v3120_v58 }
 0x31d   : > { %v1912_v32 = vadd.f32 %v3136_v43, %v1812_v18 }
 0x31f   : > { %1944 = vst [vmem:[%s3143_s15 + $0xe8] sm:$0xff] %v1912_v32  ;;  %v1689_v38 = vpop.f32.mrf.mxu2 }
 0x320   : > { %v1778_v1 = vpop.f32.mrf.mxu3 }
 0x321   : > { %v1779_v40 = vadd.f32 %v1778_v1, %v1689_v38 }
 0x323   : > { %v1813_v34 = vadd.f32 %v1779_v40, %v3122_v5 }
 0x325   : > { %v1913_v22 = vadd.f32 %v3136_v43, %v1813_v34 }
 0x327   : > { %1945 = vst [vmem:[%s3143_s15 + $0xf0] sm:$0xff] %v1913_v22  ;;  %v1691_v58 = vpop.f32.mrf.mxu2 }
 0x328   : > { %v1780_v17 = vpop.f32.mrf.mxu3 }
 0x329   : > { %v1781_v4 = vadd.f32 %v1780_v17, %v1691_v58 }
 0x32b   : > { %v1814_v48 = vadd.f32 %v1781_v4, %v3128_v31 }
 0x32d   : > { %v1914_v5 = vadd.f32 %v3136_v43, %v1814_v48 }
 0x32f   : > { %1946 = vst [vmem:[%s3143_s15 + $0xf8] sm:$0xff] %v1914_v5 }
 0x330   : > { %2506 = shalt.err (!%p2503_p8)
}
 0x331   : > { %s2548_s26 = smov 128   ;;  %s2549_s6 = smov 8  }
 0x332   : > { %2400 = dma.vmem_to_hbm [thread:$0]  (%p2618_p5), %s1961_s12, 4096, %s1963_s13, %s1948_s22, %s2548_s26, %s2548_s26, %s2549_s6  }
 0x333 PF: > { %p2412_p9 = scmp.ge.s32.totalorder %s2545_s21, 2  ;;  %s1977_s15 = sand.u32 1, %s2533_s18  }
 0x334   : > { %s1978_s7 = scalar_lea.sflag [#allocation5], %s1977_s15 }
 0x335   : > { %p2407_p10 = pnand %p2412_p9, %p2622_p6 }
 0x337   : > { %p2408_p11 = pneg %p2407_p10 }
 0x339   : > { %2528 = dma.done.wait (%p2408_p11), %s1978_s7, 4096  }
 0x33a   : > { %2530 = vsyncadd (%p2408_p11), %s1978_s7, 4294963200  ;;  %p16_p12 = scmp.ge.s32.totalorder %s2605_s24, 4   ;;  %s3306_s18 = smov %s2537_s19 }
 0x33b   : > { %s3307_s19 = smov %s2541_s20  ;;  %s3308_s20 = smov %s2616_s27 }
 0x33c   : > { %s3309_s21 = smov %s2605_s24  ;;  %18 = sbr.rel (!%p16_p12) target bundleno = 4 (0x4), region = 80 }
 0x341   :  { %1984 = vsyncpa [#allocation4], 1 }
 0x342   :  { %1986 = vsyncpa [#allocation4 + $0x1], 1 }
 0x343   :  { %1987 = vsyncpa [#allocation5], 1 }
 0x344   :  { %1989 = vsyncpa [#allocation5 + $0x1], 1 }

</bundles_post_ra>
